<compile_context>
chip_gen: v6e
topology: v6e:2x2x1
jax: 0.10.0
libtpu: 0.0.40
codegen_flags: <defaults>
</compile_context>

<pallas_src>
import jax
import jax.numpy as jnp
from jax.experimental import pallas as pl
from jax.experimental.pallas import tpu as pltpu

# ---------------- small synthetic GPT-Neo config ----------------
VOCAB = 128
MAX_POS = 64
HIDDEN = 32          # d_model
N_LAYERS = 2
N_HEADS = 4
HEAD_DIM = HIDDEN // N_HEADS
FFN = 4 * HIDDEN
BBOX = 4             # bbox_size
LN_EPS = 1e-5


# ---------------- in-kernel helpers (value level, fp32) ----------------
def _ln(x, g, b):
    mean = jnp.mean(x, axis=-1, keepdims=True)
    xc = x - mean
    var = jnp.mean(xc * xc, axis=-1, keepdims=True)
    return xc * jax.lax.rsqrt(var + LN_EPS) * g + b


def _gelu_new(x):
    # gelu_new (tanh approximation), as in HF GPT-Neo MLP; tanh goes to the EUP slot.
    c = 0.7978845608028654  # sqrt(2/pi)
    return 0.5 * x * (1.0 + jnp.tanh(c * (x + 0.044715 * x * x * x)))


# ---------------- fused whole-model kernel ----------------
def _fused_forward_kernel(h0_ref, bbox_ref,
                          ln1_g_ref, ln1_b_ref, qkv_w_ref,
                          o_w_ref, o_b_ref,
                          ln2_g_ref, ln2_b_ref,
                          fc_w_ref, fc_b_ref, proj_w_ref, proj_b_ref,
                          lnf_g_ref, lnf_b_ref, wte_ref,
                          seg_w_ref, seg_b_ref,
                          logits_ref, seg_ref,
                          attn_scratch):
    S = h0_ref.shape[1]

    # --- seg_pos_emb linear, folded into the same kernel ---
    bbox = bbox_ref[0].astype(jnp.float32)                                   # (S, BBOX)
    seg = jnp.dot(bbox, seg_w_ref[...],
                  preferred_element_type=jnp.float32) + seg_b_ref[...]
    seg_ref[0] = seg.astype(seg_ref.dtype)

    # causal mask (shared across layers/heads)
    row = jax.lax.broadcasted_iota(jnp.int32, (S, S), 0)
    col = jax.lax.broadcasted_iota(jnp.int32, (S, S), 1)
    causal = col <= row
    neg = float(jnp.finfo(jnp.float32).min)   # GPT-Neo mask value (fp32 math -> safe)

    h = h0_ref[0].astype(jnp.float32)                                        # (S, HIDDEN)

    # TODO(synk): HF GPT-Neo alternates global/local(window=256) attention per layer;
    # full causal attention here is equivalent while S <= window (true for S=8).
    for layer in range(N_LAYERS):
        # ---- attention block: LN1 -> fused QKV -> per-head softmax(QK^T)V -> o-proj + residual
        hn = _ln(h, ln1_g_ref[layer], ln1_b_ref[layer])
        qkv = jnp.dot(hn, qkv_w_ref[layer],
                      preferred_element_type=jnp.float32)                   # (S, 3*HIDDEN)
        q = qkv[:, 0:HIDDEN]
        k = qkv[:, HIDDEN:2 * HIDDEN]
        v = qkv[:, 2 * HIDDEN:3 * HIDDEN]
        for hd in range(N_HEADS):
            lo = hd * HEAD_DIM
            q_h = q[:, lo:lo + HEAD_DIM]
            k_h = k[:, lo:lo + HEAD_DIM]
            v_h = v[:, lo:lo + HEAD_DIM]
            # GPT-Neo: fp32 scores, NO 1/sqrt(head_dim) scaling (matches HF).
            s = jnp.einsum('qd,kd->qk', q_h, k_h,
                           preferred_element_type=jnp.float32)              # (S, S)
            s = jnp.where(causal, s, neg)
            s = s - jnp.max(s, axis=-1, keepdims=True)
            p = jnp.exp(s)
            p = p / jnp.sum(p, axis=-1, keepdims=True)
            attn_scratch[:, lo:lo + HEAD_DIM] = jnp.dot(
                p, v_h, preferred_element_type=jnp.float32)
        attn = attn_scratch[...]                                             # (S, HIDDEN)
        # o-proj with bias, residual add fused
        h = h + jnp.dot(attn, o_w_ref[layer],
                        preferred_element_type=jnp.float32) + o_b_ref[layer]

        # ---- MLP block: LN2 -> fc -> gelu_new -> proj, residual fused
        hn = _ln(h, ln2_g_ref[layer], ln2_b_ref[layer])
        ff = jnp.dot(hn, fc_w_ref[layer],
                     preferred_element_type=jnp.float32) + fc_b_ref[layer]  # (S, FFN)
        ff = _gelu_new(ff)
        h = h + jnp.dot(ff, proj_w_ref[layer],
                        preferred_element_type=jnp.float32) + proj_b_ref[layer]

    # ---- final LN + tied lm_head (contract wte on its hidden dim; no transpose, no bias)
    hf = _ln(h, lnf_g_ref[...], lnf_b_ref[...])
    logits = jnp.einsum('sd,vd->sv', hf, wte_ref[...],
                        preferred_element_type=jnp.float32)                  # (S, VOCAB)
    logits_ref[0] = logits.astype(logits_ref.dtype)


# ---------------- deterministic parameter init (stacked, QKV fused) ----------------
def init_params(key):
    ks = jax.random.split(key, 8)

    def w(k, shape, scale=0.02):
        return (scale * jax.random.normal(k, shape)).astype(jnp.float32)

    return {
        "wte": w(ks[0], (VOCAB, HIDDEN)),
        "wpe": w(ks[1], (MAX_POS, HIDDEN)),
        "ln_f_g": jnp.ones((1, HIDDEN), jnp.float32),
        "ln_f_b": jnp.zeros((1, HIDDEN), jnp.float32),
        # GPTNeoRearranger.seg_pos_emb = nn.Linear(bbox_size, d_model)
        "seg_w": w(ks[2], (BBOX, HIDDEN)),
        "seg_b": jnp.zeros((1, HIDDEN), jnp.float32),
        # per-layer weights stacked on a leading layer axis; q/k/v fused (no bias in GPT-Neo)
        "ln1_g": jnp.ones((N_LAYERS, 1, HIDDEN), jnp.float32),
        "ln1_b": jnp.zeros((N_LAYERS, 1, HIDDEN), jnp.float32),
        "qkv_w": w(ks[3], (N_LAYERS, HIDDEN, 3 * HIDDEN)),
        "o_w": w(ks[4], (N_LAYERS, HIDDEN, HIDDEN)),
        "o_b": jnp.zeros((N_LAYERS, 1, HIDDEN), jnp.float32),
        "ln2_g": jnp.ones((N_LAYERS, 1, HIDDEN), jnp.float32),
        "ln2_b": jnp.zeros((N_LAYERS, 1, HIDDEN), jnp.float32),
        "fc_w": w(ks[5], (N_LAYERS, HIDDEN, FFN)),
        "fc_b": jnp.zeros((N_LAYERS, 1, FFN), jnp.float32),
        "proj_w": w(ks[6], (N_LAYERS, FFN, HIDDEN)),
        "proj_b": jnp.zeros((N_LAYERS, 1, HIDDEN), jnp.float32),
    }


# ---------------- forward ----------------
def gpt_neo_rearranger_forward(params, input_ids, bboxes):
    """
    input_ids: (B, S) int32     bboxes: (B, S, BBOX) f32
    Returns (lm_logits (B, S, VOCAB), seg_pos_emb (B, S, HIDDEN)).
    """
    # TODO(synk): reference GPTNeoRearranger.forward has an empty body (returns None);
    # we return the constituent computations of its submodules instead of faking more.
    B, S = input_ids.shape

    # Embedding gathers are glue (irregular gather), left to XLA; everything after
    # the embedding add runs inside one fused Pallas call.
    pos_ids = jnp.arange(S)
    h0 = (jnp.take(params["wte"], input_ids, axis=0)
          + jnp.take(params["wpe"], pos_ids, axis=0)[None]).astype(jnp.float32)

    tok_map = lambda b: (b, 0, 0)        # per-batch activation blocks
    w_map2 = lambda b: (0, 0)            # weights: same block every grid step (no re-DMA)
    w_map3 = lambda b: (0, 0, 0)

    in_specs = [
        pl.BlockSpec((1, S, HIDDEN), tok_map),                  # h0
        pl.BlockSpec((1, S, BBOX), tok_map),                    # bboxes
        pl.BlockSpec((N_LAYERS, 1, HIDDEN), w_map3),            # ln1_g
        pl.BlockSpec((N_LAYERS, 1, HIDDEN), w_map3),            # ln1_b
        pl.BlockSpec((N_LAYERS, HIDDEN, 3 * HIDDEN), w_map3),   # qkv_w
        pl.BlockSpec((N_LAYERS, HIDDEN, HIDDEN), w_map3),       # o_w
        pl.BlockSpec((N_LAYERS, 1, HIDDEN), w_map3),            # o_b
        pl.BlockSpec((N_LAYERS, 1, HIDDEN), w_map3),            # ln2_g
        pl.BlockSpec((N_LAYERS, 1, HIDDEN), w_map3),            # ln2_b
        pl.BlockSpec((N_LAYERS, HIDDEN, FFN), w_map3),          # fc_w
        pl.BlockSpec((N_LAYERS, 1, FFN), w_map3),               # fc_b
        pl.BlockSpec((N_LAYERS, FFN, HIDDEN), w_map3),          # proj_w
        pl.BlockSpec((N_LAYERS, 1, HIDDEN), w_map3),            # proj_b
        pl.BlockSpec((1, HIDDEN), w_map2),                      # ln_f_g
        pl.BlockSpec((1, HIDDEN), w_map2),                      # ln_f_b
        pl.BlockSpec((VOCAB, HIDDEN), w_map2),                  # wte (tied lm_head)
        pl.BlockSpec((BBOX, HIDDEN), w_map2),                   # seg_w
        pl.BlockSpec((1, HIDDEN), w_map2),                      # seg_b
    ]
    out_specs = (
        pl.BlockSpec((1, S, VOCAB), tok_map),   # logits: lane-dense (last dim = 128)
        pl.BlockSpec((1, S, HIDDEN), tok_map),  # seg_pos_emb
    )

    logits, seg = pl.pallas_call(
        _fused_forward_kernel,
        out_shape=(jax.ShapeDtypeStruct((B, S, VOCAB), jnp.float32),
                   jax.ShapeDtypeStruct((B, S, HIDDEN), jnp.float32)),
        grid=(B,),
        in_specs=in_specs,
        out_specs=out_specs,
        scratch_shapes=[pltpu.VMEM((S, HIDDEN), jnp.float32)],
        compiler_params=pltpu.CompilerParams(
            dimension_semantics=("parallel",)),   # batch split -> both v7x TCs busy
    )(h0, bboxes,
      params["ln1_g"], params["ln1_b"], params["qkv_w"],
      params["o_w"], params["o_b"],
      params["ln2_g"], params["ln2_b"],
      params["fc_w"], params["fc_b"], params["proj_w"], params["proj_b"],
      params["ln_f_g"], params["ln_f_b"], params["wte"],
      params["seg_w"], params["seg_b"])
    return logits, seg


# ---------------- pure-JAX reference (correctness check only) ----------------
def _reference_forward(params, input_ids, bboxes):
    B, S = input_ids.shape
    seg = jnp.einsum('bsk,kh->bsh', bboxes, params["seg_w"]) + params["seg_b"]
    pos = jnp.arange(S)
    h = jnp.take(params["wte"], input_ids, axis=0) + params["wpe"][pos][None]

    def ln(x, g, b):
        m = jnp.mean(x, -1, keepdims=True)
        v = jnp.mean((x - m) ** 2, -1, keepdims=True)
        return (x - m) * jax.lax.rsqrt(v + LN_EPS) * g + b

    mask = jnp.tril(jnp.ones((S, S), bool))
    for l in range(N_LAYERS):
        hn = ln(h, params["ln1_g"][l], params["ln1_b"][l])
        qkv = jnp.einsum('bsh,hn->bsn', hn, params["qkv_w"][l])
        q, k, v = jnp.split(qkv, 3, axis=-1)
        q = q.reshape(B, S, N_HEADS, HEAD_DIM)
        k = k.reshape(B, S, N_HEADS, HEAD_DIM)
        v = v.reshape(B, S, N_HEADS, HEAD_DIM)
        s = jnp.einsum('bqnd,bknd->bnqk', q, k)
        s = jnp.where(mask, s, jnp.finfo(jnp.float32).min)
        p = jax.nn.softmax(s, axis=-1)
        a = jnp.einsum('bnqk,bknd->bqnd', p, v).reshape(B, S, HIDDEN)
        h = h + jnp.einsum('bsh,hk->bsk', a, params["o_w"][l]) + params["o_b"][l]
        hn = ln(h, params["ln2_g"][l], params["ln2_b"][l])
        ff = jnp.einsum('bsh,hf->bsf', hn, params["fc_w"][l]) + params["fc_b"][l]
        c = 0.7978845608028654
        ff = 0.5 * ff * (1.0 + jnp.tanh(c * (ff + 0.044715 * ff ** 3)))
        h = h + jnp.einsum('bsf,fh->bsh', ff, params["proj_w"][l]) + params["proj_b"][l]
    h = ln(h, params["ln_f_g"], params["ln_f_b"])
    logits = jnp.einsum('bsh,vh->bsv', h, params["wte"])
    return logits, seg


if __name__ == "__main__":
    key = jax.random.PRNGKey(0)
    pkey, ikey, bkey = jax.random.split(key, 3)
    params = init_params(pkey)

    B, S = 2, 8
    input_ids = jax.random.randint(ikey, (B, S), 0, VOCAB, dtype=jnp.int32)
    bboxes = jax.random.uniform(bkey, (B, S, BBOX), dtype=jnp.float32)

    fwd = jax.jit(gpt_neo_rearranger_forward)
    logits, seg = fwd(params, input_ids, bboxes)
    jax.block_until_ready((logits, seg))
    assert logits.shape == (B, S, VOCAB) and seg.shape == (B, S, HIDDEN)

    # numerical sanity check against pure-JAX reference
    ref_logits, ref_seg = _reference_forward(params, input_ids, bboxes)
    assert jnp.allclose(logits, ref_logits, atol=2e-3, rtol=2e-3)
    assert jnp.allclose(seg, ref_seg, atol=2e-3, rtol=2e-3)

    print("KERNEL_OK")
</pallas_src>

<mosaic_0001>
module attributes {stable_mosaic.version = 11 : i64} {
  func.func @_fused_forward_kernel(%arg0: i32, %arg1: memref<1x8x32xf32, #tpu.memory_space<vmem>>, %arg2: memref<1x8x4xf32, #tpu.memory_space<vmem>>, %arg3: memref<2x1x32xf32, #tpu.memory_space<vmem>>, %arg4: memref<2x1x32xf32, #tpu.memory_space<vmem>>, %arg5: memref<2x32x96xf32, #tpu.memory_space<vmem>>, %arg6: memref<2x32x32xf32, #tpu.memory_space<vmem>>, %arg7: memref<2x1x32xf32, #tpu.memory_space<vmem>>, %arg8: memref<2x1x32xf32, #tpu.memory_space<vmem>>, %arg9: memref<2x1x32xf32, #tpu.memory_space<vmem>>, %arg10: memref<2x32x128xf32, #tpu.memory_space<vmem>>, %arg11: memref<2x1x128xf32, #tpu.memory_space<vmem>>, %arg12: memref<2x128x32xf32, #tpu.memory_space<vmem>>, %arg13: memref<2x1x32xf32, #tpu.memory_space<vmem>>, %arg14: memref<1x32xf32, #tpu.memory_space<vmem>>, %arg15: memref<1x32xf32, #tpu.memory_space<vmem>>, %arg16: memref<128x32xf32, #tpu.memory_space<vmem>>, %arg17: memref<4x32xf32, #tpu.memory_space<vmem>>, %arg18: memref<1x32xf32, #tpu.memory_space<vmem>>, %arg19: memref<1x8x128xf32, #tpu.memory_space<vmem>>, %arg20: memref<1x8x32xf32, #tpu.memory_space<vmem>>, %arg21: memref<8x32xf32, #tpu.memory_space<vmem>>) attributes {dimension_semantics = [#tpu.dimension_semantics<parallel>], iteration_bounds = array<i64: 2>, scalar_prefetch = 0 : i64, scratch_operands = 1 : i64, tpu.core_type = #tpu.core_type<tc>, window_params = [{transform_indices = @transform_0, window_bounds = array<i64: 1, 8, 32>}, {transform_indices = @transform_1, window_bounds = array<i64: 1, 8, 4>}, {pipeline_mode = #tpu.pipeline_mode<synchronous>, transform_indices = @transform_2, window_bounds = array<i64: 2, 1, 32>}, {pipeline_mode = #tpu.pipeline_mode<synchronous>, transform_indices = @transform_3, window_bounds = array<i64: 2, 1, 32>}, {pipeline_mode = #tpu.pipeline_mode<synchronous>, transform_indices = @transform_4, window_bounds = array<i64: 2, 32, 96>}, {pipeline_mode = #tpu.pipeline_mode<synchronous>, transform_indices = @transform_5, window_bounds = array<i64: 2, 32, 32>}, {pipeline_mode = #tpu.pipeline_mode<synchronous>, transform_indices = @transform_6, window_bounds = array<i64: 2, 1, 32>}, {pipeline_mode = #tpu.pipeline_mode<synchronous>, transform_indices = @transform_7, window_bounds = array<i64: 2, 1, 32>}, {pipeline_mode = #tpu.pipeline_mode<synchronous>, transform_indices = @transform_8, window_bounds = array<i64: 2, 1, 32>}, {pipeline_mode = #tpu.pipeline_mode<synchronous>, transform_indices = @transform_9, window_bounds = array<i64: 2, 32, 128>}, {pipeline_mode = #tpu.pipeline_mode<synchronous>, transform_indices = @transform_10, window_bounds = array<i64: 2, 1, 128>}, {pipeline_mode = #tpu.pipeline_mode<synchronous>, transform_indices = @transform_11, window_bounds = array<i64: 2, 128, 32>}, {pipeline_mode = #tpu.pipeline_mode<synchronous>, transform_indices = @transform_12, window_bounds = array<i64: 2, 1, 32>}, {pipeline_mode = #tpu.pipeline_mode<synchronous>, transform_indices = @transform_13, window_bounds = array<i64: 1, 32>}, {pipeline_mode = #tpu.pipeline_mode<synchronous>, transform_indices = @transform_14, window_bounds = array<i64: 1, 32>}, {pipeline_mode = #tpu.pipeline_mode<synchronous>, transform_indices = @transform_15, window_bounds = array<i64: 128, 32>}, {pipeline_mode = #tpu.pipeline_mode<synchronous>, transform_indices = @transform_16, window_bounds = array<i64: 4, 32>}, {pipeline_mode = #tpu.pipeline_mode<synchronous>, transform_indices = @transform_17, window_bounds = array<i64: 1, 32>}, {transform_indices = @transform_18, window_bounds = array<i64: 1, 8, 128>}, {transform_indices = @transform_19, window_bounds = array<i64: 1, 8, 32>}]} {
    %c0 = arith.constant 0 : index
    %c0_0 = arith.constant 0 : index
    %c0_1 = arith.constant 0 : index
    %0 = vector.load %arg2[%c0, %c0_0, %c0_1] : memref<1x8x4xf32, #tpu.memory_space<vmem>>, vector<1x8x4xf32>
    %1 = vector.shape_cast %0 : vector<1x8x4xf32> to vector<8x4xf32>
    %c0_2 = arith.constant 0 : index
    %c0_3 = arith.constant 0 : index
    %2 = vector.load %arg17[%c0_2, %c0_3] : memref<4x32xf32, #tpu.memory_space<vmem>>, vector<4x32xf32>
    %cst = arith.constant dense<0.000000e+00> : vector<8x32xf32>
    %3 = tpu.matmul %1, %2, %cst {dimension_numbers = #tpu.dot_dimension_numbers<[1], [0], [0], [1], [0, 0, 1, 1], [], []>} : vector<8x4xf32>, vector<4x32xf32>, vector<8x32xf32> -> vector<8x32xf32>
    %c0_4 = arith.constant 0 : index
    %c0_5 = arith.constant 0 : index
    %4 = vector.load %arg18[%c0_4, %c0_5] : memref<1x32xf32, #tpu.memory_space<vmem>>, vector<1x32xf32>
    %5 = vector.broadcast %4 : vector<1x32xf32> to vector<8x32xf32>
    %6 = arith.addf %3, %5 : vector<8x32xf32>
    %c0_6 = arith.constant 0 : index
    %c0_7 = arith.constant 0 : index
    %c0_8 = arith.constant 0 : index
    %7 = vector.load %arg20[%c0_6, %c0_7, %c0_8] : memref<1x8x32xf32, #tpu.memory_space<vmem>>, vector<1x8x32xf32>
    %8 = vector.shape_cast %7 : vector<1x8x32xf32> to vector<8x32xf32>
    %9 = vector.shape_cast %6 : vector<8x32xf32> to vector<1x8x32xf32>
    tpu.vector_store %arg20[%c0_6, %c0_7, %c0_8], %9 {strides = array<i32>} : memref<1x8x32xf32, #tpu.memory_space<vmem>>, vector<1x8x32xf32>,
    %10 = tpu.iota {dimensions = array<i32: 0>} : vector<8x8xi32>
    %11 = tpu.iota {dimensions = array<i32: 1>} : vector<8x8xi32>
    %12 = arith.cmpi sle, %11, %10 : vector<8x8xi32>
    %c0_9 = arith.constant 0 : index
    %c0_10 = arith.constant 0 : index
    %c0_11 = arith.constant 0 : index
    %13 = vector.load %arg1[%c0_9, %c0_10, %c0_11] : memref<1x8x32xf32, #tpu.memory_space<vmem>>, vector<1x8x32xf32>
    %14 = vector.shape_cast %13 : vector<1x8x32xf32> to vector<8x32xf32>
    %c0_12 = arith.constant 0 : index
    %c0_13 = arith.constant 0 : index
    %c0_14 = arith.constant 0 : index
    %15 = vector.load %arg3[%c0_12, %c0_13, %c0_14] : memref<2x1x32xf32, #tpu.memory_space<vmem>>, vector<1x1x32xf32>
    %16 = vector.shape_cast %15 : vector<1x1x32xf32> to vector<1x32xf32>
    %c0_15 = arith.constant 0 : index
    %c0_16 = arith.constant 0 : index
    %c0_17 = arith.constant 0 : index
    %17 = vector.load %arg4[%c0_15, %c0_16, %c0_17] : memref<2x1x32xf32, #tpu.memory_space<vmem>>, vector<1x1x32xf32>
    %18 = vector.shape_cast %17 : vector<1x1x32xf32> to vector<1x32xf32>
    %cst_18 = arith.constant dense<0.000000e+00> : vector<8xf32>
    %19 = vector.multi_reduction <add>, %14, %cst_18 [1] : vector<8x32xf32> to vector<8xf32>
    %20 = vector.shape_cast %19 : vector<8xf32> to vector<8x1xf32>
    %cst_19 = arith.constant 3.200000e+01 : f32
    %21 = vector.broadcast %cst_19 : f32 to vector<8x1xf32>
    %22 = arith.divf %20, %21 : vector<8x1xf32>
    %23 = vector.broadcast %22 : vector<8x1xf32> to vector<8x32xf32>
    %24 = arith.subf %14, %23 : vector<8x32xf32>
    %25 = arith.mulf %24, %24 : vector<8x32xf32>
    %cst_20 = arith.constant dense<0.000000e+00> : vector<8xf32>
    %26 = vector.multi_reduction <add>, %25, %cst_20 [1] : vector<8x32xf32> to vector<8xf32>
    %27 = vector.shape_cast %26 : vector<8xf32> to vector<8x1xf32>
    %cst_21 = arith.constant 3.200000e+01 : f32
    %28 = vector.broadcast %cst_21 : f32 to vector<8x1xf32>
    %29 = arith.divf %27, %28 : vector<8x1xf32>
    %cst_22 = arith.constant 9.99999974E-6 : f32
    %30 = vector.broadcast %cst_22 : f32 to vector<8x1xf32>
    %31 = arith.addf %29, %30 : vector<8x1xf32>
    %32 = math.rsqrt %31 : vector<8x1xf32>
    %33 = vector.broadcast %32 : vector<8x1xf32> to vector<8x32xf32>
    %34 = arith.mulf %24, %33 : vector<8x32xf32>
    %35 = vector.broadcast %16 : vector<1x32xf32> to vector<8x32xf32>
    %36 = arith.mulf %34, %35 : vector<8x32xf32>
    %37 = vector.broadcast %18 : vector<1x32xf32> to vector<8x32xf32>
    %38 = arith.addf %36, %37 : vector<8x32xf32>
    %c0_23 = arith.constant 0 : index
    %c0_24 = arith.constant 0 : index
    %c0_25 = arith.constant 0 : index
    %39 = vector.load %arg5[%c0_23, %c0_24, %c0_25] : memref<2x32x96xf32, #tpu.memory_space<vmem>>, vector<1x32x96xf32>
    %40 = vector.shape_cast %39 : vector<1x32x96xf32> to vector<32x96xf32>
    %cst_26 = arith.constant dense<0.000000e+00> : vector<8x96xf32>
    %41 = tpu.matmul %38, %40, %cst_26 {dimension_numbers = #tpu.dot_dimension_numbers<[1], [0], [0], [1], [0, 0, 1, 1], [], []>} : vector<8x32xf32>, vector<32x96xf32>, vector<8x96xf32> -> vector<8x96xf32>
    %42 = vector.extract_strided_slice %41 {offsets = [0, 0], sizes = [8, 32], strides = [1, 1]} : vector<8x96xf32> to vector<8x32xf32>
    %43 = vector.extract_strided_slice %41 {offsets = [0, 32], sizes = [8, 32], strides = [1, 1]} : vector<8x96xf32> to vector<8x32xf32>
    %44 = vector.extract_strided_slice %41 {offsets = [0, 64], sizes = [8, 32], strides = [1, 1]} : vector<8x96xf32> to vector<8x32xf32>
    %45 = vector.extract_strided_slice %42 {offsets = [0, 0], sizes = [8, 8], strides = [1, 1]} : vector<8x32xf32> to vector<8x8xf32>
    %46 = vector.extract_strided_slice %43 {offsets = [0, 0], sizes = [8, 8], strides = [1, 1]} : vector<8x32xf32> to vector<8x8xf32>
    %47 = vector.extract_strided_slice %44 {offsets = [0, 0], sizes = [8, 8], strides = [1, 1]} : vector<8x32xf32> to vector<8x8xf32>
    "tpu.trace_start"() <{level = 10 : i32, message = "qd,kd->qk"}> : () -> ()
    %cst_27 = arith.constant dense<0.000000e+00> : vector<8x8xf32>
    %48 = tpu.matmul %45, %46, %cst_27 {dimension_numbers = #tpu.dot_dimension_numbers<[1], [1], [0], [0], [0, 0, 1, 0], [], []>} : vector<8x8xf32>, vector<8x8xf32>, vector<8x8xf32> -> vector<8x8xf32>
    %cst_28 = arith.constant -3.40282347E+38 : f32
    "tpu.trace_stop"() : () -> ()
    %49 = vector.broadcast %cst_28 : f32 to vector<8x8xf32>
    %50 = arith.select %12, %48, %49 : vector<8x8xi1>, vector<8x8xf32>
    %cst_29 = arith.constant dense<0xFF800000> : vector<8xf32>
    %51 = vector.multi_reduction <maximumf>, %50, %cst_29 [1] : vector<8x8xf32> to vector<8xf32>
    %52 = vector.shape_cast %51 : vector<8xf32> to vector<8x1xf32>
    %53 = vector.broadcast %52 : vector<8x1xf32> to vector<8x8xf32>
    %54 = arith.subf %50, %53 : vector<8x8xf32>
    %55 = math.exp %54 : vector<8x8xf32>
    %cst_30 = arith.constant dense<0.000000e+00> : vector<8xf32>
    %56 = vector.multi_reduction <add>, %55, %cst_30 [1] : vector<8x8xf32> to vector<8xf32>
    %57 = vector.shape_cast %56 : vector<8xf32> to vector<8x1xf32>
    %58 = vector.broadcast %57 : vector<8x1xf32> to vector<8x8xf32>
    %59 = arith.divf %55, %58 : vector<8x8xf32>
    %cst_31 = arith.constant dense<0.000000e+00> : vector<8x8xf32>
    %60 = tpu.matmul %59, %47, %cst_31 {dimension_numbers = #tpu.dot_dimension_numbers<[1], [0], [0], [1], [0, 0, 1, 1], [], []>} : vector<8x8xf32>, vector<8x8xf32>, vector<8x8xf32> -> vector<8x8xf32>
    %c0_32 = arith.constant 0 : index
    %c0_33 = arith.constant 0 : index
    %61 = vector.load %arg21[%c0_32, %c0_33] : memref<8x32xf32, #tpu.memory_space<vmem>>, vector<8x8xf32>
    tpu.vector_store %arg21[%c0_32, %c0_33], %60 {strides = array<i32>} : memref<8x32xf32, #tpu.memory_space<vmem>>, vector<8x8xf32>,
    %62 = vector.extract_strided_slice %42 {offsets = [0, 8], sizes = [8, 8], strides = [1, 1]} : vector<8x32xf32> to vector<8x8xf32>
    %63 = vector.extract_strided_slice %43 {offsets = [0, 8], sizes = [8, 8], strides = [1, 1]} : vector<8x32xf32> to vector<8x8xf32>
    %64 = vector.extract_strided_slice %44 {offsets = [0, 8], sizes = [8, 8], strides = [1, 1]} : vector<8x32xf32> to vector<8x8xf32>
    "tpu.trace_start"() <{level = 10 : i32, message = "qd,kd->qk"}> : () -> ()
    %cst_34 = arith.constant dense<0.000000e+00> : vector<8x8xf32>
    %65 = tpu.matmul %62, %63, %cst_34 {dimension_numbers = #tpu.dot_dimension_numbers<[1], [1], [0], [0], [0, 0, 1, 0], [], []>} : vector<8x8xf32>, vector<8x8xf32>, vector<8x8xf32> -> vector<8x8xf32>
    %cst_35 = arith.constant -3.40282347E+38 : f32
    "tpu.trace_stop"() : () -> ()
    %66 = vector.broadcast %cst_35 : f32 to vector<8x8xf32>
    %67 = arith.select %12, %65, %66 : vector<8x8xi1>, vector<8x8xf32>
    %cst_36 = arith.constant dense<0xFF800000> : vector<8xf32>
    %68 = vector.multi_reduction <maximumf>, %67, %cst_36 [1] : vector<8x8xf32> to vector<8xf32>
    %69 = vector.shape_cast %68 : vector<8xf32> to vector<8x1xf32>
    %70 = vector.broadcast %69 : vector<8x1xf32> to vector<8x8xf32>
    %71 = arith.subf %67, %70 : vector<8x8xf32>
    %72 = math.exp %71 : vector<8x8xf32>
    %cst_37 = arith.constant dense<0.000000e+00> : vector<8xf32>
    %73 = vector.multi_reduction <add>, %72, %cst_37 [1] : vector<8x8xf32> to vector<8xf32>
    %74 = vector.shape_cast %73 : vector<8xf32> to vector<8x1xf32>
    %75 = vector.broadcast %74 : vector<8x1xf32> to vector<8x8xf32>
    %76 = arith.divf %72, %75 : vector<8x8xf32>
    %cst_38 = arith.constant dense<0.000000e+00> : vector<8x8xf32>
    %77 = tpu.matmul %76, %64, %cst_38 {dimension_numbers = #tpu.dot_dimension_numbers<[1], [0], [0], [1], [0, 0, 1, 1], [], []>} : vector<8x8xf32>, vector<8x8xf32>, vector<8x8xf32> -> vector<8x8xf32>
    %c0_39 = arith.constant 0 : index
    %c8 = arith.constant 8 : index
    %78 = vector.load %arg21[%c0_39, %c8] : memref<8x32xf32, #tpu.memory_space<vmem>>, vector<8x8xf32>
    tpu.vector_store %arg21[%c0_39, %c8], %77 {strides = array<i32>} : memref<8x32xf32, #tpu.memory_space<vmem>>, vector<8x8xf32>,
    %79 = vector.extract_strided_slice %42 {offsets = [0, 16], sizes = [8, 8], strides = [1, 1]} : vector<8x32xf32> to vector<8x8xf32>
    %80 = vector.extract_strided_slice %43 {offsets = [0, 16], sizes = [8, 8], strides = [1, 1]} : vector<8x32xf32> to vector<8x8xf32>
    %81 = vector.extract_strided_slice %44 {offsets = [0, 16], sizes = [8, 8], strides = [1, 1]} : vector<8x32xf32> to vector<8x8xf32>
    "tpu.trace_start"() <{level = 10 : i32, message = "qd,kd->qk"}> : () -> ()
    %cst_40 = arith.constant dense<0.000000e+00> : vector<8x8xf32>
    %82 = tpu.matmul %79, %80, %cst_40 {dimension_numbers = #tpu.dot_dimension_numbers<[1], [1], [0], [0], [0, 0, 1, 0], [], []>} : vector<8x8xf32>, vector<8x8xf32>, vector<8x8xf32> -> vector<8x8xf32>
    %cst_41 = arith.constant -3.40282347E+38 : f32
    "tpu.trace_stop"() : () -> ()
    %83 = vector.broadcast %cst_41 : f32 to vector<8x8xf32>
    %84 = arith.select %12, %82, %83 : vector<8x8xi1>, vector<8x8xf32>
    %cst_42 = arith.constant dense<0xFF800000> : vector<8xf32>
    %85 = vector.multi_reduction <maximumf>, %84, %cst_42 [1] : vector<8x8xf32> to vector<8xf32>
    %86 = vector.shape_cast %85 : vector<8xf32> to vector<8x1xf32>
    %87 = vector.broadcast %86 : vector<8x1xf32> to vector<8x8xf32>
    %88 = arith.subf %84, %87 : vector<8x8xf32>
    %89 = math.exp %88 : vector<8x8xf32>
    %cst_43 = arith.constant dense<0.000000e+00> : vector<8xf32>
    %90 = vector.multi_reduction <add>, %89, %cst_43 [1] : vector<8x8xf32> to vector<8xf32>
    %91 = vector.shape_cast %90 : vector<8xf32> to vector<8x1xf32>
    %92 = vector.broadcast %91 : vector<8x1xf32> to vector<8x8xf32>
    %93 = arith.divf %89, %92 : vector<8x8xf32>
    %cst_44 = arith.constant dense<0.000000e+00> : vector<8x8xf32>
    %94 = tpu.matmul %93, %81, %cst_44 {dimension_numbers = #tpu.dot_dimension_numbers<[1], [0], [0], [1], [0, 0, 1, 1], [], []>} : vector<8x8xf32>, vector<8x8xf32>, vector<8x8xf32> -> vector<8x8xf32>
    %c0_45 = arith.constant 0 : index
    %c16 = arith.constant 16 : index
    %95 = vector.load %arg21[%c0_45, %c16] : memref<8x32xf32, #tpu.memory_space<vmem>>, vector<8x8xf32>
    tpu.vector_store %arg21[%c0_45, %c16], %94 {strides = array<i32>} : memref<8x32xf32, #tpu.memory_space<vmem>>, vector<8x8xf32>,
    %96 = vector.extract_strided_slice %42 {offsets = [0, 24], sizes = [8, 8], strides = [1, 1]} : vector<8x32xf32> to vector<8x8xf32>
    %97 = vector.extract_strided_slice %43 {offsets = [0, 24], sizes = [8, 8], strides = [1, 1]} : vector<8x32xf32> to vector<8x8xf32>
    %98 = vector.extract_strided_slice %44 {offsets = [0, 24], sizes = [8, 8], strides = [1, 1]} : vector<8x32xf32> to vector<8x8xf32>
    "tpu.trace_start"() <{level = 10 : i32, message = "qd,kd->qk"}> : () -> ()
    %cst_46 = arith.constant dense<0.000000e+00> : vector<8x8xf32>
    %99 = tpu.matmul %96, %97, %cst_46 {dimension_numbers = #tpu.dot_dimension_numbers<[1], [1], [0], [0], [0, 0, 1, 0], [], []>} : vector<8x8xf32>, vector<8x8xf32>, vector<8x8xf32> -> vector<8x8xf32>
    %cst_47 = arith.constant -3.40282347E+38 : f32
    "tpu.trace_stop"() : () -> ()
    %100 = vector.broadcast %cst_47 : f32 to vector<8x8xf32>
    %101 = arith.select %12, %99, %100 : vector<8x8xi1>, vector<8x8xf32>
    %cst_48 = arith.constant dense<0xFF800000> : vector<8xf32>
    %102 = vector.multi_reduction <maximumf>, %101, %cst_48 [1] : vector<8x8xf32> to vector<8xf32>
    %103 = vector.shape_cast %102 : vector<8xf32> to vector<8x1xf32>
    %104 = vector.broadcast %103 : vector<8x1xf32> to vector<8x8xf32>
    %105 = arith.subf %101, %104 : vector<8x8xf32>
    %106 = math.exp %105 : vector<8x8xf32>
    %cst_49 = arith.constant dense<0.000000e+00> : vector<8xf32>
    %107 = vector.multi_reduction <add>, %106, %cst_49 [1] : vector<8x8xf32> to vector<8xf32>
    %108 = vector.shape_cast %107 : vector<8xf32> to vector<8x1xf32>
    %109 = vector.broadcast %108 : vector<8x1xf32> to vector<8x8xf32>
    %110 = arith.divf %106, %109 : vector<8x8xf32>
    %cst_50 = arith.constant dense<0.000000e+00> : vector<8x8xf32>
    %111 = tpu.matmul %110, %98, %cst_50 {dimension_numbers = #tpu.dot_dimension_numbers<[1], [0], [0], [1], [0, 0, 1, 1], [], []>} : vector<8x8xf32>, vector<8x8xf32>, vector<8x8xf32> -> vector<8x8xf32>
    %c0_51 = arith.constant 0 : index
    %c24 = arith.constant 24 : index
    %112 = vector.load %arg21[%c0_51, %c24] : memref<8x32xf32, #tpu.memory_space<vmem>>, vector<8x8xf32>
    tpu.vector_store %arg21[%c0_51, %c24], %111 {strides = array<i32>} : memref<8x32xf32, #tpu.memory_space<vmem>>, vector<8x8xf32>,
    %c0_52 = arith.constant 0 : index
    %c0_53 = arith.constant 0 : index
    %113 = vector.load %arg21[%c0_52, %c0_53] : memref<8x32xf32, #tpu.memory_space<vmem>>, vector<8x32xf32>
    %c0_54 = arith.constant 0 : index
    %c0_55 = arith.constant 0 : index
    %c0_56 = arith.constant 0 : index
    %114 = vector.load %arg6[%c0_54, %c0_55, %c0_56] : memref<2x32x32xf32, #tpu.memory_space<vmem>>, vector<1x32x32xf32>
    %115 = vector.shape_cast %114 : vector<1x32x32xf32> to vector<32x32xf32>
    %cst_57 = arith.constant dense<0.000000e+00> : vector<8x32xf32>
    %116 = tpu.matmul %113, %115, %cst_57 {dimension_numbers = #tpu.dot_dimension_numbers<[1], [0], [0], [1], [0, 0, 1, 1], [], []>} : vector<8x32xf32>, vector<32x32xf32>, vector<8x32xf32> -> vector<8x32xf32>
    %117 = arith.addf %14, %116 : vector<8x32xf32>
    %c0_58 = arith.constant 0 : index
    %c0_59 = arith.constant 0 : index
    %c0_60 = arith.constant 0 : index
    %118 = vector.load %arg7[%c0_58, %c0_59, %c0_60] : memref<2x1x32xf32, #tpu.memory_space<vmem>>, vector<1x1x32xf32>
    %119 = vector.shape_cast %118 : vector<1x1x32xf32> to vector<1x32xf32>
    %120 = vector.broadcast %119 : vector<1x32xf32> to vector<8x32xf32>
    %121 = arith.addf %117, %120 : vector<8x32xf32>
    %c0_61 = arith.constant 0 : index
    %c0_62 = arith.constant 0 : index
    %c0_63 = arith.constant 0 : index
    %122 = vector.load %arg8[%c0_61, %c0_62, %c0_63] : memref<2x1x32xf32, #tpu.memory_space<vmem>>, vector<1x1x32xf32>
    %123 = vector.shape_cast %122 : vector<1x1x32xf32> to vector<1x32xf32>
    %c0_64 = arith.constant 0 : index
    %c0_65 = arith.constant 0 : index
    %c0_66 = arith.constant 0 : index
    %124 = vector.load %arg9[%c0_64, %c0_65, %c0_66] : memref<2x1x32xf32, #tpu.memory_space<vmem>>, vector<1x1x32xf32>
    %125 = vector.shape_cast %124 : vector<1x1x32xf32> to vector<1x32xf32>
    %cst_67 = arith.constant dense<0.000000e+00> : vector<8xf32>
    %126 = vector.multi_reduction <add>, %121, %cst_67 [1] : vector<8x32xf32> to vector<8xf32>
    %127 = vector.shape_cast %126 : vector<8xf32> to vector<8x1xf32>
    %cst_68 = arith.constant 3.200000e+01 : f32
    %128 = vector.broadcast %cst_68 : f32 to vector<8x1xf32>
    %129 = arith.divf %127, %128 : vector<8x1xf32>
    %130 = vector.broadcast %129 : vector<8x1xf32> to vector<8x32xf32>
    %131 = arith.subf %121, %130 : vector<8x32xf32>
    %132 = arith.mulf %131, %131 : vector<8x32xf32>
    %cst_69 = arith.constant dense<0.000000e+00> : vector<8xf32>
    %133 = vector.multi_reduction <add>, %132, %cst_69 [1] : vector<8x32xf32> to vector<8xf32>
    %134 = vector.shape_cast %133 : vector<8xf32> to vector<8x1xf32>
    %cst_70 = arith.constant 3.200000e+01 : f32
    %135 = vector.broadcast %cst_70 : f32 to vector<8x1xf32>
    %136 = arith.divf %134, %135 : vector<8x1xf32>
    %cst_71 = arith.constant 9.99999974E-6 : f32
    %137 = vector.broadcast %cst_71 : f32 to vector<8x1xf32>
    %138 = arith.addf %136, %137 : vector<8x1xf32>
    %139 = math.rsqrt %138 : vector<8x1xf32>
    %140 = vector.broadcast %139 : vector<8x1xf32> to vector<8x32xf32>
    %141 = arith.mulf %131, %140 : vector<8x32xf32>
    %142 = vector.broadcast %123 : vector<1x32xf32> to vector<8x32xf32>
    %143 = arith.mulf %141, %142 : vector<8x32xf32>
    %144 = vector.broadcast %125 : vector<1x32xf32> to vector<8x32xf32>
    %145 = arith.addf %143, %144 : vector<8x32xf32>
    %c0_72 = arith.constant 0 : index
    %c0_73 = arith.constant 0 : index
    %c0_74 = arith.constant 0 : index
    %146 = vector.load %arg10[%c0_72, %c0_73, %c0_74] : memref<2x32x128xf32, #tpu.memory_space<vmem>>, vector<1x32x128xf32>
    %147 = vector.shape_cast %146 : vector<1x32x128xf32> to vector<32x128xf32>
    %cst_75 = arith.constant dense<0.000000e+00> : vector<8x128xf32>
    %148 = tpu.matmul %145, %147, %cst_75 {dimension_numbers = #tpu.dot_dimension_numbers<[1], [0], [0], [1], [0, 0, 1, 1], [], []>} : vector<8x32xf32>, vector<32x128xf32>, vector<8x128xf32> -> vector<8x128xf32>
    %c0_76 = arith.constant 0 : index
    %c0_77 = arith.constant 0 : index
    %c0_78 = arith.constant 0 : index
    %149 = vector.load %arg11[%c0_76, %c0_77, %c0_78] : memref<2x1x128xf32, #tpu.memory_space<vmem>>, vector<1x1x128xf32>
    %150 = vector.shape_cast %149 : vector<1x1x128xf32> to vector<1x128xf32>
    %151 = vector.broadcast %150 : vector<1x128xf32> to vector<8x128xf32>
    %152 = arith.addf %148, %151 : vector<8x128xf32>
    %cst_79 = arith.constant 5.000000e-01 : f32
    %153 = vector.broadcast %cst_79 : f32 to vector<8x128xf32>
    %154 = arith.mulf %153, %152 : vector<8x128xf32>
    %cst_80 = arith.constant 4.471500e-02 : f32
    %155 = vector.broadcast %cst_80 : f32 to vector<8x128xf32>
    %156 = arith.mulf %155, %152 : vector<8x128xf32>
    %157 = arith.mulf %156, %152 : vector<8x128xf32>
    %158 = arith.mulf %157, %152 : vector<8x128xf32>
    %159 = arith.addf %152, %158 : vector<8x128xf32>
    %cst_81 = arith.constant 0.797884583 : f32
    %160 = vector.broadcast %cst_81 : f32 to vector<8x128xf32>
    %161 = arith.mulf %160, %159 : vector<8x128xf32>
    %162 = math.tanh %161 : vector<8x128xf32>
    %cst_82 = arith.constant 1.000000e+00 : f32
    %163 = vector.broadcast %cst_82 : f32 to vector<8x128xf32>
    %164 = arith.addf %163, %162 : vector<8x128xf32>
    %165 = arith.mulf %154, %164 : vector<8x128xf32>
    %c0_83 = arith.constant 0 : index
    %c0_84 = arith.constant 0 : index
    %c0_85 = arith.constant 0 : index
    %166 = vector.load %arg12[%c0_83, %c0_84, %c0_85] : memref<2x128x32xf32, #tpu.memory_space<vmem>>, vector<1x128x32xf32>
    %167 = vector.shape_cast %166 : vector<1x128x32xf32> to vector<128x32xf32>
    %cst_86 = arith.constant dense<0.000000e+00> : vector<8x32xf32>
    %168 = tpu.matmul %165, %167, %cst_86 {dimension_numbers = #tpu.dot_dimension_numbers<[1], [0], [0], [1], [0, 0, 1, 1], [], []>} : vector<8x128xf32>, vector<128x32xf32>, vector<8x32xf32> -> vector<8x32xf32>
    %169 = arith.addf %121, %168 : vector<8x32xf32>
    %c0_87 = arith.constant 0 : index
    %c0_88 = arith.constant 0 : index
    %c0_89 = arith.constant 0 : index
    %170 = vector.load %arg13[%c0_87, %c0_88, %c0_89] : memref<2x1x32xf32, #tpu.memory_space<vmem>>, vector<1x1x32xf32>
    %171 = vector.shape_cast %170 : vector<1x1x32xf32> to vector<1x32xf32>
    %172 = vector.broadcast %171 : vector<1x32xf32> to vector<8x32xf32>
    %173 = arith.addf %169, %172 : vector<8x32xf32>
    %c1 = arith.constant 1 : index
    %c0_90 = arith.constant 0 : index
    %c0_91 = arith.constant 0 : index
    %174 = vector.load %arg3[%c1, %c0_90, %c0_91] : memref<2x1x32xf32, #tpu.memory_space<vmem>>, vector<1x1x32xf32>
    %175 = vector.shape_cast %174 : vector<1x1x32xf32> to vector<1x32xf32>
    %c1_92 = arith.constant 1 : index
    %c0_93 = arith.constant 0 : index
    %c0_94 = arith.constant 0 : index
    %176 = vector.load %arg4[%c1_92, %c0_93, %c0_94] : memref<2x1x32xf32, #tpu.memory_space<vmem>>, vector<1x1x32xf32>
    %177 = vector.shape_cast %176 : vector<1x1x32xf32> to vector<1x32xf32>
    %cst_95 = arith.constant dense<0.000000e+00> : vector<8xf32>
    %178 = vector.multi_reduction <add>, %173, %cst_95 [1] : vector<8x32xf32> to vector<8xf32>
    %179 = vector.shape_cast %178 : vector<8xf32> to vector<8x1xf32>
    %cst_96 = arith.constant 3.200000e+01 : f32
    %180 = vector.broadcast %cst_96 : f32 to vector<8x1xf32>
    %181 = arith.divf %179, %180 : vector<8x1xf32>
    %182 = vector.broadcast %181 : vector<8x1xf32> to vector<8x32xf32>
    %183 = arith.subf %173, %182 : vector<8x32xf32>
    %184 = arith.mulf %183, %183 : vector<8x32xf32>
    %cst_97 = arith.constant dense<0.000000e+00> : vector<8xf32>
    %185 = vector.multi_reduction <add>, %184, %cst_97 [1] : vector<8x32xf32> to vector<8xf32>
    %186 = vector.shape_cast %185 : vector<8xf32> to vector<8x1xf32>
    %cst_98 = arith.constant 3.200000e+01 : f32
    %187 = vector.broadcast %cst_98 : f32 to vector<8x1xf32>
    %188 = arith.divf %186, %187 : vector<8x1xf32>
    %cst_99 = arith.constant 9.99999974E-6 : f32
    %189 = vector.broadcast %cst_99 : f32 to vector<8x1xf32>
    %190 = arith.addf %188, %189 : vector<8x1xf32>
    %191 = math.rsqrt %190 : vector<8x1xf32>
    %192 = vector.broadcast %191 : vector<8x1xf32> to vector<8x32xf32>
    %193 = arith.mulf %183, %192 : vector<8x32xf32>
    %194 = vector.broadcast %175 : vector<1x32xf32> to vector<8x32xf32>
    %195 = arith.mulf %193, %194 : vector<8x32xf32>
    %196 = vector.broadcast %177 : vector<1x32xf32> to vector<8x32xf32>
    %197 = arith.addf %195, %196 : vector<8x32xf32>
    %c1_100 = arith.constant 1 : index
    %c0_101 = arith.constant 0 : index
    %c0_102 = arith.constant 0 : index
    %198 = vector.load %arg5[%c1_100, %c0_101, %c0_102] : memref<2x32x96xf32, #tpu.memory_space<vmem>>, vector<1x32x96xf32>
    %199 = vector.shape_cast %198 : vector<1x32x96xf32> to vector<32x96xf32>
    %cst_103 = arith.constant dense<0.000000e+00> : vector<8x96xf32>
    %200 = tpu.matmul %197, %199, %cst_103 {dimension_numbers = #tpu.dot_dimension_numbers<[1], [0], [0], [1], [0, 0, 1, 1], [], []>} : vector<8x32xf32>, vector<32x96xf32>, vector<8x96xf32> -> vector<8x96xf32>
    %201 = vector.extract_strided_slice %200 {offsets = [0, 0], sizes = [8, 32], strides = [1, 1]} : vector<8x96xf32> to vector<8x32xf32>
    %202 = vector.extract_strided_slice %200 {offsets = [0, 32], sizes = [8, 32], strides = [1, 1]} : vector<8x96xf32> to vector<8x32xf32>
    %203 = vector.extract_strided_slice %200 {offsets = [0, 64], sizes = [8, 32], strides = [1, 1]} : vector<8x96xf32> to vector<8x32xf32>
    %204 = vector.extract_strided_slice %201 {offsets = [0, 0], sizes = [8, 8], strides = [1, 1]} : vector<8x32xf32> to vector<8x8xf32>
    %205 = vector.extract_strided_slice %202 {offsets = [0, 0], sizes = [8, 8], strides = [1, 1]} : vector<8x32xf32> to vector<8x8xf32>
    %206 = vector.extract_strided_slice %203 {offsets = [0, 0], sizes = [8, 8], strides = [1, 1]} : vector<8x32xf32> to vector<8x8xf32>
    "tpu.trace_start"() <{level = 10 : i32, message = "qd,kd->qk"}> : () -> ()
    %cst_104 = arith.constant dense<0.000000e+00> : vector<8x8xf32>
    %207 = tpu.matmul %204, %205, %cst_104 {dimension_numbers = #tpu.dot_dimension_numbers<[1], [1], [0], [0], [0, 0, 1, 0], [], []>} : vector<8x8xf32>, vector<8x8xf32>, vector<8x8xf32> -> vector<8x8xf32>
    %cst_105 = arith.constant -3.40282347E+38 : f32
    "tpu.trace_stop"() : () -> ()
    %208 = vector.broadcast %cst_105 : f32 to vector<8x8xf32>
    %209 = arith.select %12, %207, %208 : vector<8x8xi1>, vector<8x8xf32>
    %cst_106 = arith.constant dense<0xFF800000> : vector<8xf32>
    %210 = vector.multi_reduction <maximumf>, %209, %cst_106 [1] : vector<8x8xf32> to vector<8xf32>
    %211 = vector.shape_cast %210 : vector<8xf32> to vector<8x1xf32>
    %212 = vector.broadcast %211 : vector<8x1xf32> to vector<8x8xf32>
    %213 = arith.subf %209, %212 : vector<8x8xf32>
    %214 = math.exp %213 : vector<8x8xf32>
    %cst_107 = arith.constant dense<0.000000e+00> : vector<8xf32>
    %215 = vector.multi_reduction <add>, %214, %cst_107 [1] : vector<8x8xf32> to vector<8xf32>
    %216 = vector.shape_cast %215 : vector<8xf32> to vector<8x1xf32>
    %217 = vector.broadcast %216 : vector<8x1xf32> to vector<8x8xf32>
    %218 = arith.divf %214, %217 : vector<8x8xf32>
    %cst_108 = arith.constant dense<0.000000e+00> : vector<8x8xf32>
    %219 = tpu.matmul %218, %206, %cst_108 {dimension_numbers = #tpu.dot_dimension_numbers<[1], [0], [0], [1], [0, 0, 1, 1], [], []>} : vector<8x8xf32>, vector<8x8xf32>, vector<8x8xf32> -> vector<8x8xf32>
    %c0_109 = arith.constant 0 : index
    %c0_110 = arith.constant 0 : index
    %220 = vector.load %arg21[%c0_109, %c0_110] : memref<8x32xf32, #tpu.memory_space<vmem>>, vector<8x8xf32>
    tpu.vector_store %arg21[%c0_109, %c0_110], %219 {strides = array<i32>} : memref<8x32xf32, #tpu.memory_space<vmem>>, vector<8x8xf32>,
    %221 = vector.extract_strided_slice %201 {offsets = [0, 8], sizes = [8, 8], strides = [1, 1]} : vector<8x32xf32> to vector<8x8xf32>
    %222 = vector.extract_strided_slice %202 {offsets = [0, 8], sizes = [8, 8], strides = [1, 1]} : vector<8x32xf32> to vector<8x8xf32>
    %223 = vector.extract_strided_slice %203 {offsets = [0, 8], sizes = [8, 8], strides = [1, 1]} : vector<8x32xf32> to vector<8x8xf32>
    "tpu.trace_start"() <{level = 10 : i32, message = "qd,kd->qk"}> : () -> ()
    %cst_111 = arith.constant dense<0.000000e+00> : vector<8x8xf32>
    %224 = tpu.matmul %221, %222, %cst_111 {dimension_numbers = #tpu.dot_dimension_numbers<[1], [1], [0], [0], [0, 0, 1, 0], [], []>} : vector<8x8xf32>, vector<8x8xf32>, vector<8x8xf32> -> vector<8x8xf32>
    %cst_112 = arith.constant -3.40282347E+38 : f32
    "tpu.trace_stop"() : () -> ()
    %225 = vector.broadcast %cst_112 : f32 to vector<8x8xf32>
    %226 = arith.select %12, %224, %225 : vector<8x8xi1>, vector<8x8xf32>
    %cst_113 = arith.constant dense<0xFF800000> : vector<8xf32>
    %227 = vector.multi_reduction <maximumf>, %226, %cst_113 [1] : vector<8x8xf32> to vector<8xf32>
    %228 = vector.shape_cast %227 : vector<8xf32> to vector<8x1xf32>
    %229 = vector.broadcast %228 : vector<8x1xf32> to vector<8x8xf32>
    %230 = arith.subf %226, %229 : vector<8x8xf32>
    %231 = math.exp %230 : vector<8x8xf32>
    %cst_114 = arith.constant dense<0.000000e+00> : vector<8xf32>
    %232 = vector.multi_reduction <add>, %231, %cst_114 [1] : vector<8x8xf32> to vector<8xf32>
    %233 = vector.shape_cast %232 : vector<8xf32> to vector<8x1xf32>
    %234 = vector.broadcast %233 : vector<8x1xf32> to vector<8x8xf32>
    %235 = arith.divf %231, %234 : vector<8x8xf32>
    %cst_115 = arith.constant dense<0.000000e+00> : vector<8x8xf32>
    %236 = tpu.matmul %235, %223, %cst_115 {dimension_numbers = #tpu.dot_dimension_numbers<[1], [0], [0], [1], [0, 0, 1, 1], [], []>} : vector<8x8xf32>, vector<8x8xf32>, vector<8x8xf32> -> vector<8x8xf32>
    %c0_116 = arith.constant 0 : index
    %c8_117 = arith.constant 8 : index
    %237 = vector.load %arg21[%c0_116, %c8_117] : memref<8x32xf32, #tpu.memory_space<vmem>>, vector<8x8xf32>
    tpu.vector_store %arg21[%c0_116, %c8_117], %236 {strides = array<i32>} : memref<8x32xf32, #tpu.memory_space<vmem>>, vector<8x8xf32>,
    %238 = vector.extract_strided_slice %201 {offsets = [0, 16], sizes = [8, 8], strides = [1, 1]} : vector<8x32xf32> to vector<8x8xf32>
    %239 = vector.extract_strided_slice %202 {offsets = [0, 16], sizes = [8, 8], strides = [1, 1]} : vector<8x32xf32> to vector<8x8xf32>
    %240 = vector.extract_strided_slice %203 {offsets = [0, 16], sizes = [8, 8], strides = [1, 1]} : vector<8x32xf32> to vector<8x8xf32>
    "tpu.trace_start"() <{level = 10 : i32, message = "qd,kd->qk"}> : () -> ()
    %cst_118 = arith.constant dense<0.000000e+00> : vector<8x8xf32>
    %241 = tpu.matmul %238, %239, %cst_118 {dimension_numbers = #tpu.dot_dimension_numbers<[1], [1], [0], [0], [0, 0, 1, 0], [], []>} : vector<8x8xf32>, vector<8x8xf32>, vector<8x8xf32> -> vector<8x8xf32>
    %cst_119 = arith.constant -3.40282347E+38 : f32
    "tpu.trace_stop"() : () -> ()
    %242 = vector.broadcast %cst_119 : f32 to vector<8x8xf32>
    %243 = arith.select %12, %241, %242 : vector<8x8xi1>, vector<8x8xf32>
    %cst_120 = arith.constant dense<0xFF800000> : vector<8xf32>
    %244 = vector.multi_reduction <maximumf>, %243, %cst_120 [1] : vector<8x8xf32> to vector<8xf32>
    %245 = vector.shape_cast %244 : vector<8xf32> to vector<8x1xf32>
    %246 = vector.broadcast %245 : vector<8x1xf32> to vector<8x8xf32>
    %247 = arith.subf %243, %246 : vector<8x8xf32>
    %248 = math.exp %247 : vector<8x8xf32>
    %cst_121 = arith.constant dense<0.000000e+00> : vector<8xf32>
    %249 = vector.multi_reduction <add>, %248, %cst_121 [1] : vector<8x8xf32> to vector<8xf32>
    %250 = vector.shape_cast %249 : vector<8xf32> to vector<8x1xf32>
    %251 = vector.broadcast %250 : vector<8x1xf32> to vector<8x8xf32>
    %252 = arith.divf %248, %251 : vector<8x8xf32>
    %cst_122 = arith.constant dense<0.000000e+00> : vector<8x8xf32>
    %253 = tpu.matmul %252, %240, %cst_122 {dimension_numbers = #tpu.dot_dimension_numbers<[1], [0], [0], [1], [0, 0, 1, 1], [], []>} : vector<8x8xf32>, vector<8x8xf32>, vector<8x8xf32> -> vector<8x8xf32>
    %c0_123 = arith.constant 0 : index
    %c16_124 = arith.constant 16 : index
    %254 = vector.load %arg21[%c0_123, %c16_124] : memref<8x32xf32, #tpu.memory_space<vmem>>, vector<8x8xf32>
    tpu.vector_store %arg21[%c0_123, %c16_124], %253 {strides = array<i32>} : memref<8x32xf32, #tpu.memory_space<vmem>>, vector<8x8xf32>,
    %255 = vector.extract_strided_slice %201 {offsets = [0, 24], sizes = [8, 8], strides = [1, 1]} : vector<8x32xf32> to vector<8x8xf32>
    %256 = vector.extract_strided_slice %202 {offsets = [0, 24], sizes = [8, 8], strides = [1, 1]} : vector<8x32xf32> to vector<8x8xf32>
    %257 = vector.extract_strided_slice %203 {offsets = [0, 24], sizes = [8, 8], strides = [1, 1]} : vector<8x32xf32> to vector<8x8xf32>
    "tpu.trace_start"() <{level = 10 : i32, message = "qd,kd->qk"}> : () -> ()
    %cst_125 = arith.constant dense<0.000000e+00> : vector<8x8xf32>
    %258 = tpu.matmul %255, %256, %cst_125 {dimension_numbers = #tpu.dot_dimension_numbers<[1], [1], [0], [0], [0, 0, 1, 0], [], []>} : vector<8x8xf32>, vector<8x8xf32>, vector<8x8xf32> -> vector<8x8xf32>
    %cst_126 = arith.constant -3.40282347E+38 : f32
    "tpu.trace_stop"() : () -> ()
    %259 = vector.broadcast %cst_126 : f32 to vector<8x8xf32>
    %260 = arith.select %12, %258, %259 : vector<8x8xi1>, vector<8x8xf32>
    %cst_127 = arith.constant dense<0xFF800000> : vector<8xf32>
    %261 = vector.multi_reduction <maximumf>, %260, %cst_127 [1] : vector<8x8xf32> to vector<8xf32>
    %262 = vector.shape_cast %261 : vector<8xf32> to vector<8x1xf32>
    %263 = vector.broadcast %262 : vector<8x1xf32> to vector<8x8xf32>
    %264 = arith.subf %260, %263 : vector<8x8xf32>
    %265 = math.exp %264 : vector<8x8xf32>
    %cst_128 = arith.constant dense<0.000000e+00> : vector<8xf32>
    %266 = vector.multi_reduction <add>, %265, %cst_128 [1] : vector<8x8xf32> to vector<8xf32>
    %267 = vector.shape_cast %266 : vector<8xf32> to vector<8x1xf32>
    %268 = vector.broadcast %267 : vector<8x1xf32> to vector<8x8xf32>
    %269 = arith.divf %265, %268 : vector<8x8xf32>
    %cst_129 = arith.constant dense<0.000000e+00> : vector<8x8xf32>
    %270 = tpu.matmul %269, %257, %cst_129 {dimension_numbers = #tpu.dot_dimension_numbers<[1], [0], [0], [1], [0, 0, 1, 1], [], []>} : vector<8x8xf32>, vector<8x8xf32>, vector<8x8xf32> -> vector<8x8xf32>
    %c0_130 = arith.constant 0 : index
    %c24_131 = arith.constant 24 : index
    %271 = vector.load %arg21[%c0_130, %c24_131] : memref<8x32xf32, #tpu.memory_space<vmem>>, vector<8x8xf32>
    tpu.vector_store %arg21[%c0_130, %c24_131], %270 {strides = array<i32>} : memref<8x32xf32, #tpu.memory_space<vmem>>, vector<8x8xf32>,
    %c0_132 = arith.constant 0 : index
    %c0_133 = arith.constant 0 : index
    %272 = vector.load %arg21[%c0_132, %c0_133] : memref<8x32xf32, #tpu.memory_space<vmem>>, vector<8x32xf32>
    %c1_134 = arith.constant 1 : index
    %c0_135 = arith.constant 0 : index
    %c0_136 = arith.constant 0 : index
    %273 = vector.load %arg6[%c1_134, %c0_135, %c0_136] : memref<2x32x32xf32, #tpu.memory_space<vmem>>, vector<1x32x32xf32>
    %274 = vector.shape_cast %273 : vector<1x32x32xf32> to vector<32x32xf32>
    %cst_137 = arith.constant dense<0.000000e+00> : vector<8x32xf32>
    %275 = tpu.matmul %272, %274, %cst_137 {dimension_numbers = #tpu.dot_dimension_numbers<[1], [0], [0], [1], [0, 0, 1, 1], [], []>} : vector<8x32xf32>, vector<32x32xf32>, vector<8x32xf32> -> vector<8x32xf32>
    %276 = arith.addf %173, %275 : vector<8x32xf32>
    %c1_138 = arith.constant 1 : index
    %c0_139 = arith.constant 0 : index
    %c0_140 = arith.constant 0 : index
    %277 = vector.load %arg7[%c1_138, %c0_139, %c0_140] : memref<2x1x32xf32, #tpu.memory_space<vmem>>, vector<1x1x32xf32>
    %278 = vector.shape_cast %277 : vector<1x1x32xf32> to vector<1x32xf32>
    %279 = vector.broadcast %278 : vector<1x32xf32> to vector<8x32xf32>
    %280 = arith.addf %276, %279 : vector<8x32xf32>
    %c1_141 = arith.constant 1 : index
    %c0_142 = arith.constant 0 : index
    %c0_143 = arith.constant 0 : index
    %281 = vector.load %arg8[%c1_141, %c0_142, %c0_143] : memref<2x1x32xf32, #tpu.memory_space<vmem>>, vector<1x1x32xf32>
    %282 = vector.shape_cast %281 : vector<1x1x32xf32> to vector<1x32xf32>
    %c1_144 = arith.constant 1 : index
    %c0_145 = arith.constant 0 : index
    %c0_146 = arith.constant 0 : index
    %283 = vector.load %arg9[%c1_144, %c0_145, %c0_146] : memref<2x1x32xf32, #tpu.memory_space<vmem>>, vector<1x1x32xf32>
    %284 = vector.shape_cast %283 : vector<1x1x32xf32> to vector<1x32xf32>
    %cst_147 = arith.constant dense<0.000000e+00> : vector<8xf32>
    %285 = vector.multi_reduction <add>, %280, %cst_147 [1] : vector<8x32xf32> to vector<8xf32>
    %286 = vector.shape_cast %285 : vector<8xf32> to vector<8x1xf32>
    %cst_148 = arith.constant 3.200000e+01 : f32
    %287 = vector.broadcast %cst_148 : f32 to vector<8x1xf32>
    %288 = arith.divf %286, %287 : vector<8x1xf32>
    %289 = vector.broadcast %288 : vector<8x1xf32> to vector<8x32xf32>
    %290 = arith.subf %280, %289 : vector<8x32xf32>
    %291 = arith.mulf %290, %290 : vector<8x32xf32>
    %cst_149 = arith.constant dense<0.000000e+00> : vector<8xf32>
    %292 = vector.multi_reduction <add>, %291, %cst_149 [1] : vector<8x32xf32> to vector<8xf32>
    %293 = vector.shape_cast %292 : vector<8xf32> to vector<8x1xf32>
    %cst_150 = arith.constant 3.200000e+01 : f32
    %294 = vector.broadcast %cst_150 : f32 to vector<8x1xf32>
    %295 = arith.divf %293, %294 : vector<8x1xf32>
    %cst_151 = arith.constant 9.99999974E-6 : f32
    %296 = vector.broadcast %cst_151 : f32 to vector<8x1xf32>
    %297 = arith.addf %295, %296 : vector<8x1xf32>
    %298 = math.rsqrt %297 : vector<8x1xf32>
    %299 = vector.broadcast %298 : vector<8x1xf32> to vector<8x32xf32>
    %300 = arith.mulf %290, %299 : vector<8x32xf32>
    %301 = vector.broadcast %282 : vector<1x32xf32> to vector<8x32xf32>
    %302 = arith.mulf %300, %301 : vector<8x32xf32>
    %303 = vector.broadcast %284 : vector<1x32xf32> to vector<8x32xf32>
    %304 = arith.addf %302, %303 : vector<8x32xf32>
    %c1_152 = arith.constant 1 : index
    %c0_153 = arith.constant 0 : index
    %c0_154 = arith.constant 0 : index
    %305 = vector.load %arg10[%c1_152, %c0_153, %c0_154] : memref<2x32x128xf32, #tpu.memory_space<vmem>>, vector<1x32x128xf32>
    %306 = vector.shape_cast %305 : vector<1x32x128xf32> to vector<32x128xf32>
    %cst_155 = arith.constant dense<0.000000e+00> : vector<8x128xf32>
    %307 = tpu.matmul %304, %306, %cst_155 {dimension_numbers = #tpu.dot_dimension_numbers<[1], [0], [0], [1], [0, 0, 1, 1], [], []>} : vector<8x32xf32>, vector<32x128xf32>, vector<8x128xf32> -> vector<8x128xf32>
    %c1_156 = arith.constant 1 : index
    %c0_157 = arith.constant 0 : index
    %c0_158 = arith.constant 0 : index
    %308 = vector.load %arg11[%c1_156, %c0_157, %c0_158] : memref<2x1x128xf32, #tpu.memory_space<vmem>>, vector<1x1x128xf32>
    %309 = vector.shape_cast %308 : vector<1x1x128xf32> to vector<1x128xf32>
    %310 = vector.broadcast %309 : vector<1x128xf32> to vector<8x128xf32>
    %311 = arith.addf %307, %310 : vector<8x128xf32>
    %cst_159 = arith.constant 5.000000e-01 : f32
    %312 = vector.broadcast %cst_159 : f32 to vector<8x128xf32>
    %313 = arith.mulf %312, %311 : vector<8x128xf32>
    %cst_160 = arith.constant 4.471500e-02 : f32
    %314 = vector.broadcast %cst_160 : f32 to vector<8x128xf32>
    %315 = arith.mulf %314, %311 : vector<8x128xf32>
    %316 = arith.mulf %315, %311 : vector<8x128xf32>
    %317 = arith.mulf %316, %311 : vector<8x128xf32>
    %318 = arith.addf %311, %317 : vector<8x128xf32>
    %cst_161 = arith.constant 0.797884583 : f32
    %319 = vector.broadcast %cst_161 : f32 to vector<8x128xf32>
    %320 = arith.mulf %319, %318 : vector<8x128xf32>
    %321 = math.tanh %320 : vector<8x128xf32>
    %cst_162 = arith.constant 1.000000e+00 : f32
    %322 = vector.broadcast %cst_162 : f32 to vector<8x128xf32>
    %323 = arith.addf %322, %321 : vector<8x128xf32>
    %324 = arith.mulf %313, %323 : vector<8x128xf32>
    %c1_163 = arith.constant 1 : index
    %c0_164 = arith.constant 0 : index
    %c0_165 = arith.constant 0 : index
    %325 = vector.load %arg12[%c1_163, %c0_164, %c0_165] : memref<2x128x32xf32, #tpu.memory_space<vmem>>, vector<1x128x32xf32>
    %326 = vector.shape_cast %325 : vector<1x128x32xf32> to vector<128x32xf32>
    %cst_166 = arith.constant dense<0.000000e+00> : vector<8x32xf32>
    %327 = tpu.matmul %324, %326, %cst_166 {dimension_numbers = #tpu.dot_dimension_numbers<[1], [0], [0], [1], [0, 0, 1, 1], [], []>} : vector<8x128xf32>, vector<128x32xf32>, vector<8x32xf32> -> vector<8x32xf32>
    %328 = arith.addf %280, %327 : vector<8x32xf32>
    %c1_167 = arith.constant 1 : index
    %c0_168 = arith.constant 0 : index
    %c0_169 = arith.constant 0 : index
    %329 = vector.load %arg13[%c1_167, %c0_168, %c0_169] : memref<2x1x32xf32, #tpu.memory_space<vmem>>, vector<1x1x32xf32>
    %330 = vector.shape_cast %329 : vector<1x1x32xf32> to vector<1x32xf32>
    %331 = vector.broadcast %330 : vector<1x32xf32> to vector<8x32xf32>
    %332 = arith.addf %328, %331 : vector<8x32xf32>
    %c0_170 = arith.constant 0 : index
    %c0_171 = arith.constant 0 : index
    %333 = vector.load %arg14[%c0_170, %c0_171] : memref<1x32xf32, #tpu.memory_space<vmem>>, vector<1x32xf32>
    %c0_172 = arith.constant 0 : index
    %c0_173 = arith.constant 0 : index
    %334 = vector.load %arg15[%c0_172, %c0_173] : memref<1x32xf32, #tpu.memory_space<vmem>>, vector<1x32xf32>
    %cst_174 = arith.constant dense<0.000000e+00> : vector<8xf32>
    %335 = vector.multi_reduction <add>, %332, %cst_174 [1] : vector<8x32xf32> to vector<8xf32>
    %336 = vector.shape_cast %335 : vector<8xf32> to vector<8x1xf32>
    %cst_175 = arith.constant 3.200000e+01 : f32
    %337 = vector.broadcast %cst_175 : f32 to vector<8x1xf32>
    %338 = arith.divf %336, %337 : vector<8x1xf32>
    %339 = vector.broadcast %338 : vector<8x1xf32> to vector<8x32xf32>
    %340 = arith.subf %332, %339 : vector<8x32xf32>
    %341 = arith.mulf %340, %340 : vector<8x32xf32>
    %cst_176 = arith.constant dense<0.000000e+00> : vector<8xf32>
    %342 = vector.multi_reduction <add>, %341, %cst_176 [1] : vector<8x32xf32> to vector<8xf32>
    %343 = vector.shape_cast %342 : vector<8xf32> to vector<8x1xf32>
    %cst_177 = arith.constant 3.200000e+01 : f32
    %344 = vector.broadcast %cst_177 : f32 to vector<8x1xf32>
    %345 = arith.divf %343, %344 : vector<8x1xf32>
    %cst_178 = arith.constant 9.99999974E-6 : f32
    %346 = vector.broadcast %cst_178 : f32 to vector<8x1xf32>
    %347 = arith.addf %345, %346 : vector<8x1xf32>
    %348 = math.rsqrt %347 : vector<8x1xf32>
    %349 = vector.broadcast %348 : vector<8x1xf32> to vector<8x32xf32>
    %350 = arith.mulf %340, %349 : vector<8x32xf32>
    %351 = vector.broadcast %333 : vector<1x32xf32> to vector<8x32xf32>
    %352 = arith.mulf %350, %351 : vector<8x32xf32>
    %353 = vector.broadcast %334 : vector<1x32xf32> to vector<8x32xf32>
    %354 = arith.addf %352, %353 : vector<8x32xf32>
    %c0_179 = arith.constant 0 : index
    %c0_180 = arith.constant 0 : index
    %355 = vector.load %arg16[%c0_179, %c0_180] : memref<128x32xf32, #tpu.memory_space<vmem>>, vector<128x32xf32>
    "tpu.trace_start"() <{level = 10 : i32, message = "sd,vd->sv"}> : () -> ()
    %cst_181 = arith.constant dense<0.000000e+00> : vector<8x128xf32>
    %356 = tpu.matmul %354, %355, %cst_181 {dimension_numbers = #tpu.dot_dimension_numbers<[1], [1], [0], [0], [0, 0, 1, 0], [], []>} : vector<8x32xf32>, vector<128x32xf32>, vector<8x128xf32> -> vector<8x128xf32>
    "tpu.trace_stop"() : () -> ()
    %c0_182 = arith.constant 0 : index
    %c0_183 = arith.constant 0 : index
    %c0_184 = arith.constant 0 : index
    %357 = vector.load %arg19[%c0_182, %c0_183, %c0_184] : memref<1x8x128xf32, #tpu.memory_space<vmem>>, vector<1x8x128xf32>
    %358 = vector.shape_cast %357 : vector<1x8x128xf32> to vector<8x128xf32>
    %359 = vector.shape_cast %356 : vector<8x128xf32> to vector<1x8x128xf32>
    tpu.vector_store %arg19[%c0_182, %c0_183, %c0_184], %359 {strides = array<i32>} : memref<1x8x128xf32, #tpu.memory_space<vmem>>, vector<1x8x128xf32>,
    return
  }
  func.func @transform_0(%arg0: i32) -> (i32, i32, i32) {
    %c0_i32 = arith.constant 0 : i32
    %c0_i32_0 = arith.constant 0 : i32
    %c0_i32_1 = arith.constant 0 : i32
    return %arg0, %c0_i32, %c0_i32_0 : i32, i32, i32
  }
  func.func @transform_1(%arg0: i32) -> (i32, i32, i32) {
    %c0_i32 = arith.constant 0 : i32
    %c0_i32_0 = arith.constant 0 : i32
    %c0_i32_1 = arith.constant 0 : i32
    return %arg0, %c0_i32, %c0_i32_0 : i32, i32, i32
  }
  func.func @transform_2(%arg0: i32) -> (i32, i32, i32) {
    %c0_i32 = arith.constant 0 : i32
    %c0_i32_0 = arith.constant 0 : i32
    %c0_i32_1 = arith.constant 0 : i32
    %c0_i32_2 = arith.constant 0 : i32
    return %c0_i32, %c0_i32_0, %c0_i32_1 : i32, i32, i32
  }
  func.func @transform_3(%arg0: i32) -> (i32, i32, i32) {
    %c0_i32 = arith.constant 0 : i32
    %c0_i32_0 = arith.constant 0 : i32
    %c0_i32_1 = arith.constant 0 : i32
    %c0_i32_2 = arith.constant 0 : i32
    return %c0_i32, %c0_i32_0, %c0_i32_1 : i32, i32, i32
  }
  func.func @transform_4(%arg0: i32) -> (i32, i32, i32) {
    %c0_i32 = arith.constant 0 : i32
    %c0_i32_0 = arith.constant 0 : i32
    %c0_i32_1 = arith.constant 0 : i32
    %c0_i32_2 = arith.constant 0 : i32
    return %c0_i32, %c0_i32_0, %c0_i32_1 : i32, i32, i32
  }
  func.func @transform_5(%arg0: i32) -> (i32, i32, i32) {
    %c0_i32 = arith.constant 0 : i32
    %c0_i32_0 = arith.constant 0 : i32
    %c0_i32_1 = arith.constant 0 : i32
    %c0_i32_2 = arith.constant 0 : i32
    return %c0_i32, %c0_i32_0, %c0_i32_1 : i32, i32, i32
  }
  func.func @transform_6(%arg0: i32) -> (i32, i32, i32) {
    %c0_i32 = arith.constant 0 : i32
    %c0_i32_0 = arith.constant 0 : i32
    %c0_i32_1 = arith.constant 0 : i32
    %c0_i32_2 = arith.constant 0 : i32
    return %c0_i32, %c0_i32_0, %c0_i32_1 : i32, i32, i32
  }
  func.func @transform_7(%arg0: i32) -> (i32, i32, i32) {
    %c0_i32 = arith.constant 0 : i32
    %c0_i32_0 = arith.constant 0 : i32
    %c0_i32_1 = arith.constant 0 : i32
    %c0_i32_2 = arith.constant 0 : i32
    return %c0_i32, %c0_i32_0, %c0_i32_1 : i32, i32, i32
  }
  func.func @transform_8(%arg0: i32) -> (i32, i32, i32) {
    %c0_i32 = arith.constant 0 : i32
    %c0_i32_0 = arith.constant 0 : i32
    %c0_i32_1 = arith.constant 0 : i32
    %c0_i32_2 = arith.constant 0 : i32
    return %c0_i32, %c0_i32_0, %c0_i32_1 : i32, i32, i32
  }
  func.func @transform_9(%arg0: i32) -> (i32, i32, i32) {
    %c0_i32 = arith.constant 0 : i32
    %c0_i32_0 = arith.constant 0 : i32
    %c0_i32_1 = arith.constant 0 : i32
    %c0_i32_2 = arith.constant 0 : i32
    return %c0_i32, %c0_i32_0, %c0_i32_1 : i32, i32, i32
  }
  func.func @transform_10(%arg0: i32) -> (i32, i32, i32) {
    %c0_i32 = arith.constant 0 : i32
    %c0_i32_0 = arith.constant 0 : i32
    %c0_i32_1 = arith.constant 0 : i32
    %c0_i32_2 = arith.constant 0 : i32
    return %c0_i32, %c0_i32_0, %c0_i32_1 : i32, i32, i32
  }
  func.func @transform_11(%arg0: i32) -> (i32, i32, i32) {
    %c0_i32 = arith.constant 0 : i32
    %c0_i32_0 = arith.constant 0 : i32
    %c0_i32_1 = arith.constant 0 : i32
    %c0_i32_2 = arith.constant 0 : i32
    return %c0_i32, %c0_i32_0, %c0_i32_1 : i32, i32, i32
  }
  func.func @transform_12(%arg0: i32) -> (i32, i32, i32) {
    %c0_i32 = arith.constant 0 : i32
    %c0_i32_0 = arith.constant 0 : i32
    %c0_i32_1 = arith.constant 0 : i32
    %c0_i32_2 = arith.constant 0 : i32
    return %c0_i32, %c0_i32_0, %c0_i32_1 : i32, i32, i32
  }
  func.func @transform_13(%arg0: i32) -> (i32, i32) {
    %c0_i32 = arith.constant 0 : i32
    %c0_i32_0 = arith.constant 0 : i32
    %c0_i32_1 = arith.constant 0 : i32
    return %c0_i32, %c0_i32_0 : i32, i32
  }
  func.func @transform_14(%arg0: i32) -> (i32, i32) {
    %c0_i32 = arith.constant 0 : i32
    %c0_i32_0 = arith.constant 0 : i32
    %c0_i32_1 = arith.constant 0 : i32
    return %c0_i32, %c0_i32_0 : i32, i32
  }
  func.func @transform_15(%arg0: i32) -> (i32, i32) {
    %c0_i32 = arith.constant 0 : i32
    %c0_i32_0 = arith.constant 0 : i32
    %c0_i32_1 = arith.constant 0 : i32
    return %c0_i32, %c0_i32_0 : i32, i32
  }
  func.func @transform_16(%arg0: i32) -> (i32, i32) {
    %c0_i32 = arith.constant 0 : i32
    %c0_i32_0 = arith.constant 0 : i32
    %c0_i32_1 = arith.constant 0 : i32
    return %c0_i32, %c0_i32_0 : i32, i32
  }
  func.func @transform_17(%arg0: i32) -> (i32, i32) {
    %c0_i32 = arith.constant 0 : i32
    %c0_i32_0 = arith.constant 0 : i32
    %c0_i32_1 = arith.constant 0 : i32
    return %c0_i32, %c0_i32_0 : i32, i32
  }
  func.func @transform_18(%arg0: i32) -> (i32, i32, i32) {
    %c0_i32 = arith.constant 0 : i32
    %c0_i32_0 = arith.constant 0 : i32
    %c0_i32_1 = arith.constant 0 : i32
    return %arg0, %c0_i32, %c0_i32_0 : i32, i32, i32
  }
  func.func @transform_19(%arg0: i32) -> (i32, i32, i32) {
    %c0_i32 = arith.constant 0 : i32
    %c0_i32_0 = arith.constant 0 : i32
    %c0_i32_1 = arith.constant 0 : i32
    return %arg0, %c0_i32, %c0_i32_0 : i32, i32, i32
  }
}

</mosaic_0001>

<bundles_post_ra>
// kernel: gpt_neo_rearranger_forward.1
= control target key start
LH: loop header
LB: loop body
LE: loop exit
PB: predicated region body
PF: predicated region fallthrough
CT: control target
= control target key end

     0   :  { %s4749_s0 = inlined_call_operand.vmem [shape: f32[2,8,32], index: 0, kind: input, shape index: {}]   ;;  %s4750_s1 = inlined_call_operand.vmem [shape: f32[2,8,4], index: 1, kind: input, shape index: {}]   ;;  %s4751_s2 = inlined_call_operand.vmem [shape: f32[2,1,32], index: 2, kind: input, shape index: {}]   ;;  %s4752_s3 = inlined_call_operand.vmem [shape: f32[2,1,32], index: 3, kind: input, shape index: {}]   ;;  %s4753_s4 = inlined_call_operand.vmem [shape: f32[2,32,96], index: 4, kind: input, shape index: {}]   ;;  %s4754_s5 = inlined_call_operand.vmem [shape: f32[2,32,32], index: 5, kind: input, shape index: {}]   ;;  %s4755_s6 = inlined_call_operand.vmem [shape: f32[2,1,32], index: 6, kind: input, shape index: {}]   ;;  %s4756_s7 = inlined_call_operand.vmem [shape: f32[2,1,32], index: 7, kind: input, shape index: {}]   ;;  %s4757_s8 = inlined_call_operand.vmem [shape: f32[2,1,32], index: 8, kind: input, shape index: {}]   ;;  %s4758_s9 = inlined_call_operand.vmem [shape: f32[2,32,128], index: 9, kind: input, shape index: {}]   ;;  %s4759_s10 = inlined_call_operand.vmem [shape: f32[2,1,128], index: 10, kind: input, shape index: {}]   ;;  %s4760_s11 = inlined_call_operand.vmem [shape: f32[2,128,32], index: 11, kind: input, shape index: {}]   ;;  %s4761_s12 = inlined_call_operand.vmem [shape: f32[2,1,32], index: 12, kind: input, shape index: {}]   ;;  %s4762_s13 = inlined_call_operand.vmem [shape: f32[1,32], index: 13, kind: input, shape index: {}]   ;;  %s4763_s14 = inlined_call_operand.vmem [shape: f32[1,32], index: 14, kind: input, shape index: {}]   ;;  %s4764_s15 = inlined_call_operand.vmem [shape: f32[128,32], index: 15, kind: input, shape index: {}]   ;;  %s4765_s16 = inlined_call_operand.vmem [shape: f32[4,32], index: 16, kind: input, shape index: {}]   ;;  %s4766_s17 = inlined_call_operand.vmem [shape: f32[1,32], index: 17, kind: input, shape index: {}]   ;;  %s4767_s18 = inlined_call_operand.hbm [shape: f32[2,8,128], index: 18, kind: output, shape index: {0}]   ;;  %s4768_s19 = inlined_call_operand.hbm [shape: f32[2,8,32], index: 19, kind: output, shape index: {1}]  }
   0x1   :  { %4794 = sst [smem:[#allocation15_spill]] %s4749_s0 }
   0x2   :  { %4795 = sst [smem:[#allocation16_spill]] %s4750_s1 }
   0x3   :  { %4796 = sst [smem:[#allocation17_spill]] %s4751_s2 }
   0x4   :  { %4797 = sst [smem:[#allocation18_spill]] %s4752_s3 }
   0x5   :  { %4798 = sst [smem:[#allocation19_spill]] %s4753_s4 }
   0x6   :  { %4799 = sst [smem:[#allocation20_spill]] %s4754_s5 }
   0x7   :  { %4800 = sst [smem:[#allocation21_spill]] %s4755_s6 }
   0x8   :  { %4801 = sst [smem:[#allocation22_spill]] %s4756_s7 }
   0x9   :  { %25 = vsyncpa [#allocation4], 0 }
   0xa   :  { %27 = vsyncpa [#allocation4 + $0x1], 0 }
   0xb   :  { %28 = vsyncpa [#allocation6], 0 }
   0xc   :  { %30 = vsyncpa [#allocation6 + $0x1], 0  ;;  %s4019_s0 = smov 0   ;;  %s4021_s30 = smov 0  }
   0xd   :  { %s4023_s20 = smov 0   ;;  %s4025_s21 = smov 0  }
   0xe LB: > { %4802 = sst [smem:[#allocation9_spill]] %s3887_s0  ;;  %s4040_s1 = sadd.s32 4294967295, %s3899_s21   ;;  %s3899_s21 = sphi %s4025_s21, %s4840_s21   ;;  %s3895_s20 = sphi %s4023_s20, %s4842_s20   ;;  %s3891_s30 = sphi %s4021_s30, %s4844_s30   ;;  %s3887_s0 = sphi %s4019_s0, %s4843_s0  }
   0xf   : > { %4803 = sst [smem:[#allocation10_spill]] %s3895_s20  ;;  %s3217_s22 = sadd.s32 4294967294, %s3899_s21  }
  0x10   : > { %4804 = sst [smem:[#allocation11_spill]] %s3899_s21  ;;  %s4044_s2 = sadd.s32 1, %s3899_s21  }
  0x11   : > { %4805 = sst [smem:[#allocation12_spill]] %s4044_s2  ;;  %s431_s23 = sadd.s32 1, %s3895_s20 }
  0x12   : > { %s428_s24 = ssub.s32 %s3899_s21, %s4044_s2  ;;  %p441_p0 = scmp.ne.s32.totalorder %s3895_s20, %s3891_s30 }
  0x13   : > { %p429_p1 = scmp.eq.s32.totalorder %s428_s24, 0  ;;  %p442_p2 = scmp.eq.s32.totalorder %s4040_s1, 1 }
  0x14   : > { %p447_p3 = scmp.ne.s32.totalorder %s3891_s30, %s3887_s0  ;;  %p448_p4 = scmp.eq.s32.totalorder %s3217_s22, 1 }
  0x15   : > { %s4055_s25 = scalar_select %p429_p1, %s3895_s20, %s431_s23  }
  0x16   : > { %p4057_p5 = por %p442_p2, %p441_p0  ;;  %p4061_p6 = por %p448_p4, %p447_p3 }
  0x17   : > { %4806 = sst [smem:[#allocation13_spill]] %s4055_s25  ;;  %p3220_p7 = scmp.ge.s32.totalorder %s3899_s21, 1 }
  0x18   : > { %s4808_s26 = scalar_select %p4061_p6, 1, 0 }
  0x19   : > { %p554_p8 = scmp.lt.s32.totalorder %s3899_s21, 3 }
  0x1a   : > { %4809 = sst [smem:[#allocation14_spill]] %s4808_s26 }
  0x1b   : > { %p555_p9 = pnand %p3220_p7, %p554_p8 }
  0x1c   : > { %p618_p10 = scmp.lt.s32.totalorder (!%p555_p9), %s4040_s1, 1  ;;  %s4810_s23 = sld [smem:[#allocation15_spill]] (!%p555_p9) }
  0x1d   : > { %558 = sbr.rel (%p555_p9) target bundleno = 6327 (0x18b7), region = 92  ;;  %s4811_s4 = sld [smem:[#allocation19_spill]] (!%p555_p9) }
  0x1e   : > { %s4813_s25 = sld [smem:[#allocation18_spill]] (!%p555_p9)  ;;  %s4792_s2 = smov (!%p555_p9), 96  }
  0x1f   : > { %s4815_s0 = sld [smem:[#allocation16_spill]] (!%p555_p9)  ;;  %s4166_s22 = sand.u32 (!%p555_p9), 1, %s3891_s30  }
  0x20   : > { %s4786_s20 = smov (!%p555_p9), 64   ;;  %s4783_s29 = smov (!%p555_p9), 48  }
  0x21   : > { %s4818_s5 = sld [smem:[#allocation20_spill]] (!%p555_p9) }
  0x22   : > { %s4069_s27 = scalar_select %p618_p10, %s4040_s1, 1  ;;  %vm713_vm0 = vcmask 261120   ;;  %v3901_v8 = vmov 0.0   ;;  %vm3902_vm1 = vmmov 0   ;;  %v627_v21 = vld [vmem:[%s4765_s16] sm:$0xf]  ;;  %v715_v36 = vlaneseq }
  0x23   : > { %v754_v7 = vld [vmem:[%s4811_s4 + $0x18] sm:$0xff]  ;;  %3452 = vmatprep.subr.mxu1 %v3901_v8  ;;  %v753_v9 = vld [vmem:[%s4811_s4 + $0x10] sm:$0xff]  ;;  %3460 = vmatprep.mubr.msk.f32.mxu1 %vm3902_vm1, %v3901_v8  ;;  %v752_v10 = vld [vmem:[%s4811_s4 + $0x8] sm:$0xff]  ;;  %vm639_vm2 = vcmask 1043456   ;;  %vm635_vm3 = vcmask 31744   ;;  %vm831_vm4 = vcmask 64512  }
  0x24   : > { %s4772_s28 = sshll.u32 %s4069_s27, 3  ;;  %3453 = vmatpush3.msra.mxu1 %v754_v7  ;;  %3447 = vmatprep.subr.mxu0 %v3901_v8  ;;  %v751_v11 = vld [vmem:[%s4811_s4] sm:$0xff]  ;;  %s4814_s26 = sshll.u32 %s4069_s27, 3  ;;  %v716_v37 = vshrl.u32 %v715_v36, 7  ;;  %v718_v38 = vand.u32 127, %v715_v36  ;;  %vm1165_vm6 = vcmask 130112  }
  0x25   : > { %s621_s24 = scalar_lea.vmem %s4810_s23, %s4772_s28  ;;  %3454 = vmatprep.subr.mxu1 %v3901_v8  ;;  %3449 = vmatprep.mubr.msk.f32.mxu0 %vm3902_vm1, %v3901_v8  ;;  %s4812_s23 = sld [smem:[#allocation17_spill]]  ;;  %v3229_v18 = vld [vmem:[%s4813_s25] ss:$0 sm:$0xff]  ;;  %vm1337_vm7 = vcmask 195712   ;;  %vm1509_vm8 = vcmask 261312  }
  0x26   : > { %v4077_v0 = vld [vmem:[%s621_s24] sm:$0xff]  ;;  %3455 = vmatpush3.msra.mxu1 %v753_v9  ;;  %s625_s21 = scalar_lea.vmem %s4815_s0, %s4814_s26  ;;  %3448 = vmatpush3.msk.msra.mxu0 %vm639_vm2, %v627_v21  ;;  %s4787_s24 = smov 120   ;;  %vm4175_vm5 = vcmp.le.s32.totalorder %v718_v38, %v716_v37 }
  0x27   : > { %v723_v1 = vsel %vm713_vm0, %v4077_v0, 0.0  ;;  %3456 = vmatprep.subr.mxu1 %v3901_v8  ;;  %v626_v22 = vld [vmem:[%s625_s21] sm:$0xff]  ;;  %3463 = vmatprep.subr.mxu0 %v3901_v8  ;;  %s4788_s0 = smov 88   ;;  %s4785_s21 = smov 80  }
  0x28   : > { %724 = vadd.xlane.f32.xlu0 %v723_v1  ;;  %3457 = vmatpush3.msra.mxu1 %v752_v10  ;;  %s4781_s26 = smov 112   ;;  %s4778_s27 = smov 72   ;;  %v3225_v34 = vld [vmem:[%s4766_s17] ss:$0 sm:$0xff] }
  0x29   : > { %3458 = vmatprep.subr.mxu1 %v3901_v8  ;;  %3450 = vmatmul.mubr.msk.f32.vlgmr.msra.gmra.mxu0 %vm635_vm3, %v626_v22  ;;  %s4779_s28 = smov 104   ;;  %v1512_v37 = vld [vmem:[%s4818_s5] sm:$0xff]  ;;  %s4819_s6 = sld [smem:[#allocation21_spill]] }
  0x2a   : > { %3459 = vmatpush3.msra.mxu1 %v751_v11  ;;  %3465 = vmatprep.mubr.msk.f32.mxu0 %vm3902_vm1, %v3901_v8  ;;  %s4820_s7 = sld [smem:[#allocation22_spill]] }
  0x2b   : > { %3473 = vmatprep.subr.mxu1 %v3901_v8  ;;  %v3228_v16 = vld [vmem:[%s4812_s23] ss:$0 sm:$0xff] }
  0xb1   : > { %v725_v2 = vpop.xlane.xlu0 %724 }
  0xb2   : > { %v727_v3 = vmul.f32 0.03125, %v725_v2 }
  0xb4   : > { %v728_v4 = vsub.f32 %v4077_v0, %v727_v3 }
  0xb6   : > { %v729_v5 = vmul.f32 %v728_v4, %v728_v4 }
  0xb8   : > { %v730_v6 = vsel %vm713_vm0, %v729_v5, 0.0 }
  0xb9   : > { %731 = vadd.xlane.f32.xlu0 %v730_v6 }
  0xe9   : > { %v709_v25 = vpop.f32.mrf.mxu0 }
  0xea   : > { %v710_v35 = vadd.f32 %v3225_v34, %v709_v25 }
  0xeb   : > { %v3451_v26 = vpop.f32.mrf.mxu0 }
 0x142   : > { %v732_v12 = vpop.xlane.xlu0 %731 }
 0x143   : > { %v733_v13 = vmul.f32 0.03125, %v732_v12 }
 0x145   : > { %v734_v14 = vadd.f32 1e-05, %v733_v13 }
 0x147   : > { %3763 = vrsqrt.f32 %v734_v14 }
 0x154   : > { %v3764_v15 = vpop.eup %3763 }
 0x155   : > { %v736_v17 = vmul.f32 %v3764_v15, %v728_v4 }
 0x157   : > { %v743_v19 = vmul.f32 %v3228_v16, %v736_v17 }
 0x159   : > { %v750_v20 = vadd.f32 %v3229_v18, %v743_v19 }
 0x15b   : > { %3461 = vmatmul.mubr.msk.f32.vlgmr.msra.gmra.mxu1 %vm713_vm0, %v750_v20 }
 0x15c   : > { %3475 = vmatprep.mubr.msk.f32.mxu1 %vm3902_vm1, %v3901_v8 }
 0x21b   : > { %v4125_v23 = vpop.f32.mrf.mxu1 }
 0x21c   : > { %995 = vrot.lane.b32.xlu0 %v4125_v23, %s4787_s24  ;;  %829 = vrot.lane.b32.xlu1 %v4125_v23, %s4792_s2  ;;  %s4789_s24 = smov 24   ;;  %s4821_s2 = smov 96  }
 0x21d   : > { %v3462_v24 = vpop.f32.mrf.mxu1 }
 0x220   : > { %997 = vrot.lane.b32.xlu1 %v4125_v23, %s4788_s0  ;;  %s4823_s0 = smov 120  }
 0x224   : > { %1169 = vrot.lane.b32.xlu1 %v4125_v23, %s4785_s21  ;;  %s4790_s21 = smov 16  }
 0x228   : > { %1167 = vrot.lane.b32.xlu1 %v4125_v23, %s4781_s26  ;;  %s4784_s26 = smov 56  }
 0x22c   : > { %1341 = vrot.lane.b32.xlu1 %v4125_v23, %s4778_s27  ;;  %s4780_s27 = sshll.u32 %s4166_s22, 3 }
 0x230   : > { %1339 = vrot.lane.b32.xlu1 %v4125_v23, %s4779_s28  ;;  %s4171_s28 = scalar_lea.vmem [#allocation5], %s4780_s27  ;;  %s4782_s27 = smov 40  }
 0x231   : > { %714 = vst.msk [vmem:[%s4171_s28] sm:$0xff] %vm713_vm0, %v710_v35  ;;  %v1513_v35 = vld [vmem:[%s4818_s5 + $0x8] sm:$0xff] }
 0x28e   : > { %v830_v27 = vpop.permute.xlu1 %829  ;;  %v996_v29 = vpop.permute.xlu0 %995 }
 0x28f   : > { %3464 = vmatpush3.xpose.msk.msra.mxu0 %vm831_vm4, %v830_v27 }
 0x290   : > { %3468 = vmatprep.subr.mxu0 %v3901_v8 }
 0x292   : > { %3466 = vmatmul.mubr.msk.f32.vlgmr.msra.gmra.mxu0 %vm831_vm4, %v4125_v23  ;;  %v998_v28 = vpop.permute.xlu1 %997 }
 0x293   : > { %3474 = vmatpush3.xpose.msk.msra.mxu1 %vm831_vm4, %v998_v28  ;;  %3470 = vmatprep.mubr.msk.f32.mxu0 %vm3902_vm1, %v3901_v8 }
 0x294   : > { %3483 = vmatprep.subr.mxu1 %v3901_v8 }
 0x296   : > { %3476 = vmatmul.mubr.msk.f32.vlgmr.msra.gmra.mxu1 %vm831_vm4, %v996_v29  ;;  %v1170_v30 = vpop.permute.xlu1 %1169 }
 0x297   : > { %3484 = vmatpush3.xpose.msk.msra.mxu1 %vm831_vm4, %v1170_v30  ;;  %3485 = vmatprep.mubr.msk.f32.mxu1 %vm3902_vm1, %v3901_v8 }
 0x298   : > { %3493 = vmatprep.subr.mxu1 %v3901_v8 }
 0x29a   : > { %v1168_v31 = vpop.permute.xlu1 %1167 }
 0x29b   : > { %3486 = vmatmul.mubr.msk.f32.vlgmr.msra.gmra.mxu1 %vm831_vm4, %v1168_v31 }
 0x29c   : > { %3495 = vmatprep.mubr.msk.f32.mxu1 %vm3902_vm1, %v3901_v8 }
 0x29e   : > { %v1342_v32 = vpop.permute.xlu1 %1341 }
 0x29f   : > { %3494 = vmatpush3.xpose.msk.msra.mxu1 %vm831_vm4, %v1342_v32  ;;  %v1515_v32 = vld [vmem:[%s4818_s5 + $0x18] sm:$0xff] }
 0x2a0   : > { %3503 = vmatprep.subr.mxu1 %v3901_v8 }
 0x2a2   : > { %v1340_v33 = vpop.permute.xlu1 %1339 }
 0x2a3   : > { %3496 = vmatmul.mubr.msk.f32.vlgmr.msra.gmra.mxu1 %vm831_vm4, %v1340_v33  ;;  %v1514_v33 = vld [vmem:[%s4818_s5 + $0x10] sm:$0xff] }
 0x2a4   : > { %3511 = vmatprep.mubr.msk.f32.mxu1 %vm3902_vm1, %v3901_v8  ;;  %3504 = vmatpush3.msra.mxu1 %v1515_v32 }
 0x2a5   : > { %3505 = vmatprep.subr.mxu1 %v3901_v8 }
 0x2a6   : > { %3506 = vmatpush3.msra.mxu1 %v1514_v33 }
 0x2a7   : > { %3507 = vmatprep.subr.mxu1 %v3901_v8 }
 0x2a8   : > { %3508 = vmatpush3.msra.mxu1 %v1513_v35 }
 0x2a9   : > { %3509 = vmatprep.subr.mxu1 %v3901_v8 }
 0x2aa   : > { %3510 = vmatpush3.msra.mxu1 %v1512_v37 }
 0x2ab   : > { %3514 = vmatprep.subr.mxu1 %v3901_v8 }
 0x352   : > { %v902_v40 = vpop.f32.mrf.mxu0 }
 0x353   : > { %v906_v41 = vsel %vm4175_vm5, %v902_v40, -3.4028235e+38 }
 0x354   : > { %v3467_v42 = vpop.f32.mrf.mxu0  ;;  %v907_v43 = vsel %vm831_vm4, %v906_v41, -inf }
 0x355   : > { %908 = vmax.xlane.f32.xlu1 %v907_v43 }
 0x356   : > { %v1069_v44 = vpop.f32.mrf.mxu1 }
 0x357   : > { %v1073_v45 = vsel %vm4175_vm5, %v1069_v44, -3.4028235e+38 }
 0x358   : > { %v3477_v46 = vpop.f32.mrf.mxu1  ;;  %v1074_v47 = vsel %vm831_vm4, %v1073_v45, -inf }
 0x359   : > { %1075 = vmax.xlane.f32.xlu0 %v1074_v47 }
 0x35b   : > { %v1241_v48 = vpop.f32.mrf.mxu1 }
 0x35c   : > { %v1245_v49 = vsel %vm4175_vm5, %v1241_v48, -3.4028235e+38  ;;  %v3244_v48 = vld [vmem:[%s4819_s6] ss:$0 sm:$0xff] }
 0x35d   : > { %v3487_v50 = vpop.f32.mrf.mxu1  ;;  %v1246_v51 = vsel %vm831_vm4, %v1245_v49, -inf }
 0x35e   : > { %1247 = vmax.xlane.f32.xlu1 %v1246_v51 }
 0x363   : > { %v1413_v52 = vpop.f32.mrf.mxu1 }
 0x364   : > { %v1417_v53 = vsel %vm4175_vm5, %v1413_v52, -3.4028235e+38 }
 0x365   : > { %v3497_v54 = vpop.f32.mrf.mxu1  ;;  %v1418_v55 = vsel %vm831_vm4, %v1417_v53, -inf }
 0x366   : > { %1419 = vmax.xlane.f32.xlu0 %v1418_v55 }
 0x36f   : > { %918 = vrot.lane.b32.xlu1 %v4125_v23, %s4786_s20  ;;  %s4791_s20 = smov 8  }
 0x3de   : > { %v909_v56 = vpop.xlane.xlu1 %908 }
 0x3df   : > { %v910_v57 = vsub.f32 %v906_v41, %v909_v56 }
 0x3e1   : > { %v911_v58 = vmul.f32 1.442695, %v910_v57 }
 0x3e2   : > { %v1076_v59 = vpop.xlane.xlu0 %1075 }
 0x3e3   : > { %3765 = vpow2.f32 %v911_v58  ;;  %v1077_v60 = vsub.f32 %v1073_v45, %v1076_v59  ;;  %v1630_v58 = vld [vmem:[%s4758_s9 + $0x18] sm:$0xff]  ;;  %v1628_v59 = vld [vmem:[%s4758_s9 + $0x8] sm:$0xff] }
 0x3e5   : > { %v1078_v61 = vmul.f32 1.442695, %v1077_v60  ;;  %v1627_v60 = vld [vmem:[%s4758_s9] sm:$0xff] }
 0x3e7   : > { %3767 = vpow2.f32 %v1078_v61  ;;  %v1248_v62 = vpop.xlane.xlu1 %1247 }
 0x3e8   : > { %v1249_v63 = vsub.f32 %v1245_v49, %v1248_v62 }
 0x3ea   : > { %v1250_v1 = vmul.f32 1.442695, %v1249_v63 }
 0x3eb   : > { %v919_v2 = vpop.permute.xlu1 %918 }
 0x3ec   : > { %3769 = vpow2.f32 %v1250_v1  ;;  %3469 = vmatpush3.msra.mxu0 %v919_v2  ;;  %v3245_v2 = vld [vmem:[%s4820_s7] ss:$0 sm:$0xff] }
 0x3ed   : > { %3478 = vmatprep.subr.mxu0 %v3901_v8 }
 0x3ef   : > { %v1420_v3 = vpop.xlane.xlu0 %1419 }
 0x3f0   : > { %v3766_v4 = vpop.eup %3765  ;;  %v1421_v5 = vsub.f32 %v1417_v53, %v1420_v3 }
 0x3f1   : > { %v913_v6 = vsel %vm831_vm4, %v3766_v4, 0.0 }
 0x3f2   : > { %v1422_v7 = vmul.f32 1.442695, %v1421_v5  ;;  %914 = vadd.xlane.f32.xlu1 %v913_v6 }
 0x3f4   : > { %v3768_v9 = vpop.eup %3767  ;;  %3771 = vpow2.f32 %v1422_v7  ;;  %v1735_v7 = vld [vmem:[%s4760_s11 + $0x78] sm:$0xff] }
 0x3f5   : > { %v1080_v10 = vsel %vm831_vm4, %v3768_v9, 0.0 }
 0x3f6   : > { %1081 = vadd.xlane.f32.xlu0 %v1080_v10  ;;  %v1733_v10 = vld [vmem:[%s4760_s11 + $0x68] sm:$0xff] }
 0x3f9   : > { %v3770_v11 = vpop.eup %3769 }
 0x3fa   : > { %v1252_v12 = vsel %vm831_vm4, %v3770_v11, 0.0 }
 0x3fb   : > { %1253 = vadd.xlane.f32.xlu1 %v1252_v12  ;;  %v1731_v12 = vld [vmem:[%s4760_s11 + $0x58] sm:$0xff] }
 0x401   : > { %v3772_v13 = vpop.eup %3771 }
 0x402   : > { %v1424_v14 = vsel %vm831_vm4, %v3772_v13, 0.0 }
 0x403   : > { %1425 = vadd.xlane.f32.xlu0 %v1424_v14  ;;  %v1729_v14 = vld [vmem:[%s4760_s11 + $0x48] sm:$0xff] }
 0x40c   : > { %1257 = vrot.lane.b32.xlu1 %v4125_v23, %s4783_s29  ;;  %s4828_s29 = smov 56  }
 0x410   : > { %1429 = vrot.lane.b32.xlu1 %v4125_v23, %s4782_s27  ;;  %s4827_s27 = smov 104  }
 0x419   : > { %1085 = vrot.lane.b32.xlu0 %v4125_v23, %s4784_s26  ;;  %s4824_s26 = smov 64  }
 0x47b   : > { %v915_v15 = vpop.xlane.xlu1 %914 }
 0x47c   : > { %3773 = vrcp.f32 %v915_v15  ;;  %v1728_v15 = vld [vmem:[%s4760_s11 + $0x40] sm:$0xff] }
 0x47f   : > { %v1082_v16 = vpop.xlane.xlu0 %1081 }
 0x480   : > { %3775 = vrcp.f32 %v1082_v16  ;;  %v1727_v16 = vld [vmem:[%s4760_s11 + $0x38] sm:$0xff] }
 0x484   : > { %v1254_v17 = vpop.xlane.xlu1 %1253 }
 0x485   : > { %3777 = vrcp.f32 %v1254_v17  ;;  %v1726_v17 = vld [vmem:[%s4760_s11 + $0x30] sm:$0xff] }
 0x488   : > { %v1258_v22 = vpop.permute.xlu1 %1257 }
 0x489   : > { %v3774_v18 = vpop.eup %3773 }
 0x48a   : > { %v917_v19 = vmul.f32 %v3774_v18, %v3766_v4  ;;  %v3246_v4 = vld [vmem:[%s4757_s8] ss:$0 sm:$0xff]  ;;  %v1725_v18 = vld [vmem:[%s4760_s11 + $0x28] sm:$0xff] }
 0x48c   : > { %3471 = vmatmul.mubr.msk.f32.vlgmr.msra.gmra.mxu0 %vm831_vm4, %v917_v19  ;;  %v1426_v20 = vpop.xlane.xlu0 %1425  ;;  %v1430_v27 = vpop.permute.xlu1 %1429  ;;  %v1724_v19 = vld [vmem:[%s4760_s11 + $0x20] sm:$0xff] }
 0x48d   : > { %v3776_v21 = vpop.eup %3775  ;;  %3779 = vrcp.f32 %v1426_v20  ;;  %3480 = vmatprep.mubr.msk.f32.mxu0 %vm3902_vm1, %v3901_v8  ;;  %v1723_v20 = vld [vmem:[%s4760_s11 + $0x18] sm:$0xff] }
 0x48e   : > { %v1084_v25 = vmul.f32 %v3776_v21, %v3768_v9  ;;  %v1734_v9 = vld [vmem:[%s4760_s11 + $0x70] sm:$0xff] }
 0x48f   : > { %v1722_v21 = vld [vmem:[%s4760_s11 + $0x10] sm:$0xff] }
 0x490   : > { %v1086_v24 = vpop.permute.xlu0 %1085 }
 0x491   : > { %3479 = vmatpush3.msra.mxu0 %v1086_v24  ;;  %v1720_v24 = vld [vmem:[%s4760_s11] sm:$0xff] }
 0x492   : > { %v3778_v23 = vpop.eup %3777  ;;  %3481 = vmatmul.mubr.msk.f32.vlgmr.msra.gmra.mxu0 %vm831_vm4, %v1084_v25  ;;  %3488 = vmatprep.subr.mxu0 %v3901_v8  ;;  %v3247_v25 = vld [vmem:[%s4759_s10] ss:$0 sm:$0xff] }
 0x493   : > { %3489 = vmatpush3.msra.mxu0 %v1258_v22  ;;  %3490 = vmatprep.mubr.msk.f32.mxu0 %vm3902_vm1, %v3901_v8  ;;  %v1256_v26 = vmul.f32 %v3778_v23, %v3770_v11  ;;  %v1732_v11 = vld [vmem:[%s4760_s11 + $0x60] sm:$0xff]  ;;  %v1721_v22 = vld [vmem:[%s4760_s11 + $0x8] sm:$0xff] }
 0x494   : > { %3498 = vmatprep.subr.mxu0 %v3901_v8 }
 0x496   : > { %3491 = vmatmul.mubr.msk.f32.vlgmr.msra.gmra.mxu0 %vm831_vm4, %v1256_v26 }
 0x497   : > { %3499 = vmatpush3.msra.mxu0 %v1430_v27  ;;  %3500 = vmatprep.mubr.msk.f32.mxu0 %vm3902_vm1, %v3901_v8 }
 0x498   : > { %3571 = vmatprep.subr.mxu0 %v3901_v8 }
 0x49a   : > { %v3780_v28 = vpop.eup %3779 }
 0x49b   : > { %v1428_v29 = vmul.f32 %v3780_v28, %v3772_v13  ;;  %v1730_v13 = vld [vmem:[%s4760_s11 + $0x50] sm:$0xff] }
 0x49d   : > { %3501 = vmatmul.mubr.msk.f32.vlgmr.msra.gmra.mxu0 %vm831_vm4, %v1428_v29 }
 0x49e   : > { %3573 = vmatprep.mubr.msk.f32.mxu0 %vm3902_vm1, %v3901_v8 }
 0x54c   : > { %v990_v30 = vpop.f32.mrf.mxu0 }
 0x54d   : > { %994 = vst.msk [vmem:[#allocation2] sm:$0xff] %vm831_vm4, %v990_v30 }
 0x54e   : > { %v3472_v31 = vpop.f32.mrf.mxu0 }
 0x552   : > { %v1157_v34 = vpop.f32.mrf.mxu0 }
 0x553   : > { %1162 = vrot.lane.b32.xlu0 %v1157_v34, %s4791_s20  ;;  %s4822_s20 = smov 88  }
 0x554   : > { %v3482_v36 = vpop.f32.mrf.mxu0 }
 0x556   : > { %v1329_v38 = vpop.f32.mrf.mxu0 }
 0x557   : > { %1334 = vrot.lane.b32.xlu1 %v1329_v38, %s4790_s21  ;;  %v3249_v38 = vld [vmem:[%s4761_s12] ss:$0 sm:$0xff]  ;;  %s4825_s21 = smov 80  }
 0x558   : > { %v3492_v40 = vpop.f32.mrf.mxu0 }
 0x55d   : > { %v1501_v41 = vpop.f32.mrf.mxu0 }
 0x55e   : > { %1506 = vrot.lane.b32.xlu0 %v1501_v41, %s4789_s24  ;;  %s4826_s24 = smov 112  }
 0x55f   : > { %v3502_v42 = vpop.f32.mrf.mxu0 }
 0x5c5   : > { %v1163_v43 = vpop.permute.xlu0 %1162 }
 0x5c6   : > { %1166 = vst.msk [vmem:[#allocation2] sm:$0xff] %vm1165_vm6, %v1163_v43 }
 0x5c9   : > { %v1335_v44 = vpop.permute.xlu1 %1334 }
 0x5ca   : > { %1338 = vst.msk [vmem:[#allocation2] sm:$0xff] %vm1337_vm7, %v1335_v44 }
 0x5d0   : > { %v1507_v45 = vpop.permute.xlu0 %1506 }
 0x5d1   : > { %1510 = vst.msk [vmem:[#allocation2] sm:$0xff] %vm1509_vm8, %v1507_v45 }
 0x5d8   : > { %v1511_v46 = vld [vmem:[#allocation2] sm:$0xff] }
 0x5d9   : > { %3512 = vmatmul.mubr.msk.f32.vlgmr.msra.gmra.mxu1 %vm713_vm0, %v1511_v46 }
 0x5da   : > { %3522 = vmatprep.mubr.msk.f32.mxu1 %vm3902_vm1, %v3901_v8  ;;  %3515 = vmatpush3.msra.mxu1 %v1630_v58 }
 0x5db   : > { %3516 = vmatprep.subr.mxu1 %v3901_v8 }
 0x699   : > { %v1585_v47 = vpop.f32.mrf.mxu1 }
 0x69a   : > { %v1589_v49 = vadd.f32 %v1585_v47, %v4077_v0  ;;  %v1629_v0 = vld [vmem:[%s4758_s9 + $0x10] sm:$0xff] }
 0x69b   : > { %v3513_v50 = vpop.f32.mrf.mxu1  ;;  %3517 = vmatpush3.msra.mxu1 %v1629_v0  ;;  %v3253_v0 = vld [vmem:[%s4813_s25 + $0x1] ss:$0 sm:$0xff] }
 0x69c   : > { %v4249_v51 = vadd.f32 %v3244_v48, %v1589_v49  ;;  %3518 = vmatprep.subr.mxu1 %v3901_v8  ;;  %v3257_v49 = vld [vmem:[%s4811_s4 + $0x38] sm:$0xff]  ;;  %v3256_v50 = vld [vmem:[%s4811_s4 + $0x30] sm:$0xff] }
 0x69d   : > { %3519 = vmatpush3.msra.mxu1 %v1628_v59 }
 0x69e   : > { %v1600_v52 = vsel %vm713_vm0, %v4249_v51, 0.0  ;;  %3520 = vmatprep.subr.mxu1 %v3901_v8 }
 0x69f   : > { %1601 = vadd.xlane.f32.xlu1 %v1600_v52  ;;  %3521 = vmatpush3.msra.mxu1 %v1627_v60  ;;  %v3254_v52 = vld [vmem:[%s4811_s4 + $0x20] sm:$0xff] }
 0x6a0   : > { %3525 = vmatprep.subr.mxu1 %v3901_v8 }
 0x728   : > { %v1602_v53 = vpop.xlane.xlu1 %1601 }
 0x729   : > { %v1603_v54 = vmul.f32 0.03125, %v1602_v53 }
 0x72b   : > { %v1604_v55 = vsub.f32 %v4249_v51, %v1603_v54 }
 0x72d   : > { %v1605_v56 = vmul.f32 %v1604_v55, %v1604_v55 }
 0x72f   : > { %v1606_v57 = vsel %vm713_vm0, %v1605_v56, 0.0 }
 0x730   : > { %1607 = vadd.xlane.f32.xlu0 %v1606_v57  ;;  %v3252_v57 = vld [vmem:[%s4812_s23 + $0x1] ss:$0 sm:$0xff] }
 0x7b9   : > { %v1608_v61 = vpop.xlane.xlu0 %1607 }
 0x7ba   : > { %v1609_v62 = vmul.f32 0.03125, %v1608_v61 }
 0x7bc   : > { %v1610_v63 = vadd.f32 1e-05, %v1609_v62 }
 0x7be   : > { %3781 = vrsqrt.f32 %v1610_v63 }
 0x7cb   : > { %v3782_v1 = vpop.eup %3781 }
 0x7cc   : > { %v1612_v3 = vmul.f32 %v3782_v1, %v1604_v55 }
 0x7ce   : > { %v1619_v5 = vmul.f32 %v3245_v2, %v1612_v3 }
 0x7d0   : > { %v1626_v6 = vadd.f32 %v3246_v4, %v1619_v5 }
 0x7d2   : > { %3523 = vmatmul.mubr.msk.f32.vlgmr.msra.gmra.mxu1 %vm713_vm0, %v1626_v6 }
 0x7d3   : > { %3557 = vmatprep.mubr.msk.f32.mxu1 %vm3902_vm1, %v3901_v8  ;;  %3526 = vmatpush3.msra.mxu1 %v1735_v7 }
 0x7d4   : > { %3527 = vmatprep.subr.mxu1 %v3901_v8 }
 0x7d5   : > { %3528 = vmatpush3.msra.mxu1 %v1734_v9 }
 0x7d6   : > { %3529 = vmatprep.subr.mxu1 %v3901_v8 }
 0x7d7   : > { %3530 = vmatpush3.msra.mxu1 %v1733_v10 }
 0x7d8   : > { %3531 = vmatprep.subr.mxu1 %v3901_v8 }
 0x7d9   : > { %3532 = vmatpush3.msra.mxu1 %v1732_v11 }
 0x7da   : > { %3533 = vmatprep.subr.mxu1 %v3901_v8 }
 0x7db   : > { %3534 = vmatpush3.msra.mxu1 %v1731_v12 }
 0x7dc   : > { %3535 = vmatprep.subr.mxu1 %v3901_v8 }
 0x7dd   : > { %3536 = vmatpush3.msra.mxu1 %v1730_v13 }
 0x7de   : > { %3537 = vmatprep.subr.mxu1 %v3901_v8 }
 0x7df   : > { %3538 = vmatpush3.msra.mxu1 %v1729_v14 }
 0x7e0   : > { %3539 = vmatprep.subr.mxu1 %v3901_v8 }
 0x7e1   : > { %3540 = vmatpush3.msra.mxu1 %v1728_v15 }
 0x7e2   : > { %3541 = vmatprep.subr.mxu1 %v3901_v8 }
 0x7e3   : > { %3542 = vmatpush3.msra.mxu1 %v1727_v16 }
 0x7e4   : > { %3543 = vmatprep.subr.mxu1 %v3901_v8 }
 0x7e5   : > { %3544 = vmatpush3.msra.mxu1 %v1726_v17 }
 0x7e6   : > { %3545 = vmatprep.subr.mxu1 %v3901_v8 }
 0x7e7   : > { %3546 = vmatpush3.msra.mxu1 %v1725_v18 }
 0x7e8   : > { %3547 = vmatprep.subr.mxu1 %v3901_v8 }
 0x7e9   : > { %3548 = vmatpush3.msra.mxu1 %v1724_v19 }
 0x7ea   : > { %3549 = vmatprep.subr.mxu1 %v3901_v8 }
 0x7eb   : > { %3550 = vmatpush3.msra.mxu1 %v1723_v20 }
 0x7ec   : > { %3551 = vmatprep.subr.mxu1 %v3901_v8 }
 0x7ed   : > { %3552 = vmatpush3.msra.mxu1 %v1722_v21 }
 0x7ee   : > { %3553 = vmatprep.subr.mxu1 %v3901_v8 }
 0x7ef   : > { %3554 = vmatpush3.msra.mxu1 %v1721_v22 }
 0x7f0   : > { %3555 = vmatprep.subr.mxu1 %v3901_v8 }
 0x7f1   : > { %3556 = vmatpush3.msra.mxu1 %v1720_v24 }
 0x7f2   : > { %3560 = vmatprep.subr.mxu1 %v3901_v8 }
 0x892   : > { %v1707_v23 = vpop.f32.mrf.mxu1 }
 0x893   : > { %v1708_v26 = vadd.f32 %v3247_v25, %v1707_v23 }
 0x894   : > { %v3524_v27 = vpop.f32.mrf.mxu1 }
 0x895   : > { %v1712_v28 = vmul.f32 0.044715, %v1708_v26  ;;  %v1711_v34 = vmul.f32 0.5, %v1708_v26 }
 0x897   : > { %v1713_v29 = vmul.f32 %v1712_v28, %v1708_v26 }
 0x899   : > { %v1714_v30 = vmul.f32 %v1713_v29, %v1708_v26 }
 0x89b   : > { %v1715_v31 = vadd.f32 %v1714_v30, %v1708_v26 }
 0x89d   : > { %v1716_v32 = vmul.f32 0.7978846, %v1715_v31 }
 0x89f   : > { %3783 = vtanh.f32 %v1716_v32 }
 0x8ac   : > { %v3784_v33 = vpop.eup %3783 }
 0x8ad   : > { %v1718_v35 = vadd.f32 1.0, %v3784_v33 }
 0x8af   : > { %v1719_v36 = vmul.f32 %v1718_v35, %v1711_v34 }
 0x8b1   : > { %3558 = vmatmul.mubr.f32.vlgmr.msra.gmra.mxu1 %v1719_v36 }
 0x8b2   : > { %3568 = vmatprep.mubr.msk.f32.mxu1 %vm3902_vm1, %v3901_v8  ;;  %3561 = vmatpush3.msra.mxu1 %v3257_v49 }
 0x8b3   : > { %3562 = vmatprep.subr.mxu1 %v3901_v8 }
 0x8b4   : > { %3563 = vmatpush3.msra.mxu1 %v3256_v50 }
 0x8b5   : > { %3564 = vmatprep.subr.mxu1 %v3901_v8 }
 0x971   : > { %v1802_v37 = vpop.f32.mrf.mxu1 }
 0x972   : > { %v1806_v40 = vadd.f32 %v1802_v37, %v4249_v51  ;;  %v3255_v51 = vld [vmem:[%s4811_s4 + $0x28] sm:$0xff]  ;;  %s3114_s4 = sshll.u32 %s4171_s28, 4  ;;  %s3115_s4 = int_to_ptr.vmem [resolvable:$true] %s3114_s4 }
 0x973   : > { %v3559_v41 = vpop.f32.mrf.mxu1  ;;  %3565 = vmatpush3.msra.mxu1 %v3255_v51 }
 0x974   : > { %v4353_v42 = vadd.f32 %v3249_v38, %v1806_v40  ;;  %3566 = vmatprep.subr.mxu1 %v3901_v8 }
 0x975   : > { %3567 = vmatpush3.msra.mxu1 %v3254_v52 }
 0x976   : > { %v1819_v43 = vsel %vm713_vm0, %v4353_v42, 0.0  ;;  %3601 = vmatprep.subr.mxu1 %v3901_v8 }
 0x977   : > { %1820 = vadd.xlane.f32.xlu0 %v1819_v43 }
 0xa00   : > { %v1821_v44 = vpop.xlane.xlu0 %1820 }
 0xa01   : > { %v1822_v45 = vmul.f32 0.03125, %v1821_v44 }
 0xa03   : > { %v1823_v46 = vsub.f32 %v4353_v42, %v1822_v45 }
 0xa05   : > { %v1824_v47 = vmul.f32 %v1823_v46, %v1823_v46 }
 0xa07   : > { %v1825_v48 = vsel %vm713_vm0, %v1824_v47, 0.0 }
 0xa08   : > { %1826 = vadd.xlane.f32.xlu1 %v1825_v48 }
 0xa91   : > { %v1827_v53 = vpop.xlane.xlu1 %1826 }
 0xa92   : > { %v1828_v54 = vmul.f32 0.03125, %v1827_v53 }
 0xa94   : > { %v1829_v55 = vadd.f32 1e-05, %v1828_v54 }
 0xa96   : > { %3785 = vrsqrt.f32 %v1829_v55 }
 0xaa3   : > { %v3786_v56 = vpop.eup %3785 }
 0xaa4   : > { %v1831_v58 = vmul.f32 %v3786_v56, %v1823_v46 }
 0xaa6   : > { %v1838_v59 = vmul.f32 %v3252_v57, %v1831_v58 }
 0xaa8   : > { %v1845_v60 = vadd.f32 %v3253_v0, %v1838_v59 }
 0xaaa   : > { %3569 = vmatmul.mubr.msk.f32.vlgmr.msra.gmra.mxu1 %vm713_vm0, %v1845_v60 }
 0xaab   : > { %3603 = vmatprep.mubr.msk.f32.mxu1 %vm3902_vm1, %v3901_v8 }
 0xb6a   : > { %v4384_v61 = vpop.f32.mrf.mxu1 }
 0xb6b   : > { %1925 = vrot.lane.b32.xlu0 %v4384_v61, %s4821_s2  ;;  %s4829_s2 = smov 72  }
 0xb6c   : > { %v3570_v62 = vpop.f32.mrf.mxu1 }
 0xb6f   : > { %2092 = vrot.lane.b32.xlu0 %v4384_v61, %s4822_s20  ;;  %s4830_s20 = smov 48  }
 0xb73   : > { %2090 = vrot.lane.b32.xlu0 %v4384_v61, %s4823_s0  ;;  %s4831_s0 = smov 8  }
 0xbdd   : > { %v1926_v63 = vpop.permute.xlu0 %1925 }
 0xbde   : > { %3572 = vmatpush3.xpose.msk.msra.mxu0 %vm831_vm4, %v1926_v63 }
 0xbdf   : > { %3576 = vmatprep.subr.mxu0 %v3901_v8 }
 0xbe1   : > { %3574 = vmatmul.mubr.msk.f32.vlgmr.msra.gmra.mxu0 %vm831_vm4, %v4384_v61  ;;  %v2093_v14 = vpop.permute.xlu0 %2092 }
 0xbe2   : > { %3578 = vmatprep.mubr.msk.f32.mxu0 %vm3902_vm1, %v3901_v8 }
 0xbe5   : > { %v2091_v16 = vpop.permute.xlu0 %2090 }
 0xca1   : > { %v1997_v1 = vpop.f32.mrf.mxu0 }
 0xca2   : > { %v2001_v2 = vsel %vm4175_vm5, %v1997_v1, -3.4028235e+38 }
 0xca3   : > { %v3575_v3 = vpop.f32.mrf.mxu0  ;;  %v2002_v4 = vsel %vm831_vm4, %v2001_v2, -inf }
 0xca4   : > { %2003 = vmax.xlane.f32.xlu1 %v2002_v4  ;;  %v3273_v3 = vld [vmem:[%s4818_s5 + $0x30] sm:$0xff]  ;;  %v3272_v4 = vld [vmem:[%s4818_s5 + $0x28] sm:$0xff] }
 0xd2d   : > { %v2004_v5 = vpop.xlane.xlu1 %2003 }
 0xd2e   : > { %v2005_v6 = vsub.f32 %v2001_v2, %v2004_v5  ;;  %v3271_v5 = vld [vmem:[%s4818_s5 + $0x20] sm:$0xff] }
 0xd30   : > { %v2006_v7 = vmul.f32 1.442695, %v2005_v6 }
 0xd32   : > { %3787 = vpow2.f32 %v2006_v7 }
 0xd3f   : > { %v3788_v9 = vpop.eup %3787 }
 0xd40   : > { %v2008_v10 = vsel %vm831_vm4, %v3788_v9, 0.0 }
 0xd41   : > { %2009 = vadd.xlane.f32.xlu1 %v2008_v10 }
 0xd52   : > { %2013 = vrot.lane.b32.xlu1 %v4384_v61, %s4824_s26  ;;  %s4832_s26 = smov 40  }
 0xdca   : > { %v2010_v11 = vpop.xlane.xlu1 %2009 }
 0xdcb   : > { %3789 = vrcp.f32 %v2010_v11 }
 0xdce   : > { %v2014_v12 = vpop.permute.xlu1 %2013 }
 0xdcf   : > { %3577 = vmatpush3.msra.mxu0 %v2014_v12 }
 0xdd0   : > { %3581 = vmatprep.subr.mxu0 %v3901_v8 }
 0xdd8   : > { %v3790_v13 = vpop.eup %3789 }
 0xdd9   : > { %v2012_v15 = vmul.f32 %v3790_v13, %v3788_v9 }
 0xddb   : > { %3579 = vmatmul.mubr.msk.f32.vlgmr.msra.gmra.mxu0 %vm831_vm4, %v2012_v15  ;;  %v3277_v15 = vld [vmem:[%s4819_s6 + $0x1] ss:$0 sm:$0xff] }
 0xddc   : > { %3582 = vmatpush3.xpose.msk.msra.mxu0 %vm831_vm4, %v2093_v14  ;;  %3583 = vmatprep.mubr.msk.f32.mxu0 %vm3902_vm1, %v3901_v8 }
 0xddd   : > { %3586 = vmatprep.subr.mxu0 %v3901_v8 }
 0xddf   : > { %3584 = vmatmul.mubr.msk.f32.vlgmr.msra.gmra.mxu0 %vm831_vm4, %v2091_v16 }
 0xde0   : > { %3588 = vmatprep.mubr.msk.f32.mxu0 %vm3902_vm1, %v3901_v8 }
 0xe9b   : > { %v2085_v17 = vpop.f32.mrf.mxu0 }
 0xe9c   : > { %2089 = vst.msk [vmem:[#allocation2] sm:$0xff] %vm831_vm4, %v2085_v17 }
 0xe9d   : > { %v3580_v18 = vpop.f32.mrf.mxu0 }
 0xe9f   : > { %v2164_v19 = vpop.f32.mrf.mxu0 }
 0xea0   : > { %v2168_v20 = vsel %vm4175_vm5, %v2164_v19, -3.4028235e+38 }
 0xea1   : > { %v3585_v21 = vpop.f32.mrf.mxu0  ;;  %v2169_v22 = vsel %vm831_vm4, %v2168_v20, -inf }
 0xea2   : > { %2170 = vmax.xlane.f32.xlu1 %v2169_v22 }
 0xeb3   : > { %2263 = vrot.lane.b32.xlu1 %v4384_v61, %s4825_s21  ;;  %s4833_s21 = smov 16  }
 0xeb7   : > { %2261 = vrot.lane.b32.xlu1 %v4384_v61, %s4826_s24  ;;  %s4834_s24 = smov 24  }
 0xebb   : > { %2432 = vrot.lane.b32.xlu1 %v4384_v61, %s4827_s27 }
 0xf2b   : > { %v2171_v24 = vpop.xlane.xlu1 %2170 }
 0xf2c   : > { %v2172_v25 = vsub.f32 %v2168_v20, %v2171_v24 }
 0xf2e   : > { %v2173_v23 = vmul.f32 1.442695, %v2172_v25 }
 0xf2f   : > { %v2264_v28 = vpop.permute.xlu1 %2263 }
 0xf30   : > { %3791 = vpow2.f32 %v2173_v23  ;;  %v3285_v23 = vld [vmem:[%s4758_s9 + $0x38] sm:$0xff] }
 0xf33   : > { %v2262_v31 = vpop.permute.xlu1 %2261 }
 0xf37   : > { %v2433_v33 = vpop.permute.xlu1 %2432 }
 0xf3d   : > { %v3792_v26 = vpop.eup %3791 }
 0xf3e   : > { %v2175_v27 = vsel %vm831_vm4, %v3792_v26, 0.0 }
 0xf3f   : > { %2176 = vadd.xlane.f32.xlu0 %v2175_v27  ;;  %v3282_v27 = vld [vmem:[%s4758_s9 + $0x20] sm:$0xff] }
 0xf55   : > { %2180 = vrot.lane.b32.xlu0 %v4384_v61, %s4828_s29 }
 0xf59   : > { %2434 = vrot.lane.b32.xlu0 %v4384_v61, %s4829_s2  ;;  %s3809_s2 = scalar_lea.vmem %s3115_s4, 128 }
 0xf5a   : > { %p3810_p11 = scmp.ne.s32.totalorder %s3115_s4, %s3809_s2 }
 0xf5c   : > { %p3811_p12 = pnand %p3810_p11, %p4057_p5 }
 0xf5e   : > { %p3812_p13 = pneg %p3811_p12 }
 0xfc8   : > { %v2177_v29 = vpop.xlane.xlu0 %2176 }
 0xfc9   : > { %3793 = vrcp.f32 %v2177_v29 }
 0xfcc   : > { %v2181_v30 = vpop.permute.xlu0 %2180 }
 0xfcd   : > { %3587 = vmatpush3.msra.mxu0 %v2181_v30 }
 0xfce   : > { %3591 = vmatprep.subr.mxu0 %v3901_v8 }
 0xfd0   : > { %v2435_v32 = vpop.permute.xlu0 %2434 }
 0xfd1   : > { %3602 = vmatpush3.xpose.msk.msra.mxu1 %vm831_vm4, %v2435_v32  ;;  %v3280_v32 = vld [vmem:[%s4820_s7 + $0x1] ss:$0 sm:$0xff] }
 0xfd2   : > { %3611 = vmatprep.subr.mxu1 %v3901_v8 }
 0xfd4   : > { %3604 = vmatmul.mubr.msk.f32.vlgmr.msra.gmra.mxu1 %vm831_vm4, %v2433_v33 }
 0xfd5   : > { %3619 = vmatprep.mubr.msk.f32.mxu1 %vm3902_vm1, %v3901_v8 }
 0xfd6   : > { %v3794_v34 = vpop.eup %3793 }
 0xfd7   : > { %v2179_v35 = vmul.f32 %v3794_v34, %v3792_v26  ;;  %v3283_v26 = vld [vmem:[%s4758_s9 + $0x28] sm:$0xff]  ;;  %v3281_v34 = vld [vmem:[%s4757_s8 + $0x1] ss:$0 sm:$0xff] }
 0xfd9   : > { %3589 = vmatmul.mubr.msk.f32.vlgmr.msra.gmra.mxu0 %vm831_vm4, %v2179_v35 }
 0xfda   : > { %3592 = vmatpush3.xpose.msk.msra.mxu0 %vm831_vm4, %v2264_v28  ;;  %3593 = vmatprep.mubr.msk.f32.mxu0 %vm3902_vm1, %v3901_v8 }
 0xfdb   : > { %3596 = vmatprep.subr.mxu0 %v3901_v8 }
 0xfdd   : > { %3594 = vmatmul.mubr.msk.f32.vlgmr.msra.gmra.mxu0 %vm831_vm4, %v2262_v31 }
 0xfde   : > { %3598 = vmatprep.mubr.msk.f32.mxu0 %vm3902_vm1, %v3901_v8 }
0x1094   : > { %v2506_v36 = vpop.f32.mrf.mxu1 }
0x1095   : > { %v2510_v37 = vsel %vm4175_vm5, %v2506_v36, -3.4028235e+38 }
0x1096   : > { %v3605_v38 = vpop.f32.mrf.mxu1  ;;  %v2511_v40 = vsel %vm831_vm4, %v2510_v37, -inf }
0x1097   : > { %2512 = vmax.xlane.f32.xlu1 %v2511_v40  ;;  %v3303_v38 = vld [vmem:[%s4760_s11 + $0xf0] sm:$0xff]  ;;  %v3302_v40 = vld [vmem:[%s4760_s11 + $0xe8] sm:$0xff] }
0x1099   : > { %v2252_v41 = vpop.f32.mrf.mxu0 }
0x109b   : > { %v3590_v43 = vpop.f32.mrf.mxu0 }
0x109c   : > { %v3300_v43 = vld [vmem:[%s4760_s11 + $0xd8] sm:$0xff] }
0x109d   : > { %v2335_v44 = vpop.f32.mrf.mxu0 }
0x109e   : > { %v2339_v45 = vsel %vm4175_vm5, %v2335_v44, -3.4028235e+38  ;;  %v3299_v44 = vld [vmem:[%s4760_s11 + $0xd0] sm:$0xff] }
0x109f   : > { %v3595_v46 = vpop.f32.mrf.mxu0  ;;  %v2340_v47 = vsel %vm831_vm4, %v2339_v45, -inf }
0x10a0   : > { %2341 = vmax.xlane.f32.xlu0 %v2340_v47  ;;  %v3297_v46 = vld [vmem:[%s4760_s11 + $0xc0] sm:$0xff]  ;;  %v3296_v47 = vld [vmem:[%s4760_s11 + $0xb8] sm:$0xff] }
0x10a8   : > { %2351 = vrot.lane.b32.xlu1 %v4384_v61, %s4830_s20  ;;  %s3917_s20 = smov [#allocation5]  }
0x10ac   : > { %2257 = vrot.lane.b32.xlu1 %v2252_v41, %s4831_s0  ;;  %v3301_v41 = vld [vmem:[%s4760_s11 + $0xe0] sm:$0xff]  ;;  %s3813_s0 = sshll.u32 %s3917_s20, 4  ;;  %s3814_s0 = int_to_ptr.vmem [resolvable:$false] %s3813_s0 }
0x10ad   : > { %p3816_p0 = scmp.lt.s32.totalorder %s3115_s4, %s3814_s0 }
0x1120   : > { %v2513_v48 = vpop.xlane.xlu1 %2512 }
0x1121   : > { %v2514_v49 = vsub.f32 %v2510_v37, %v2513_v48  ;;  %v3304_v37 = vld [vmem:[%s4760_s11 + $0xf8] sm:$0xff]  ;;  %v3295_v48 = vld [vmem:[%s4760_s11 + $0xb0] sm:$0xff] }
0x1123   : > { %v2515_v50 = vmul.f32 1.442695, %v2514_v49  ;;  %v3294_v49 = vld [vmem:[%s4760_s11 + $0xa8] sm:$0xff] }
0x1124   : > { %v2352_v51 = vpop.permute.xlu1 %2351 }
0x1125   : > { %3795 = vpow2.f32 %v2515_v50  ;;  %3597 = vmatpush3.msra.mxu0 %v2352_v51  ;;  %v3293_v50 = vld [vmem:[%s4760_s11 + $0xa0] sm:$0xff]  ;;  %v3292_v51 = vld [vmem:[%s4760_s11 + $0x98] sm:$0xff] }
0x1126   : > { %3606 = vmatprep.subr.mxu0 %v3901_v8 }
0x1128   : > { %v2258_v52 = vpop.permute.xlu1 %2257 }
0x1129   : > { %2260 = vst.msk [vmem:[#allocation2] sm:$0xff] %vm1165_vm6, %v2258_v52  ;;  %v2342_v39 = vpop.xlane.xlu0 %2341  ;;  %v3291_v52 = vld [vmem:[%s4760_s11 + $0x90] sm:$0xff] }
0x112a   : > { %v2343_v53 = vsub.f32 %v2339_v45, %v2342_v39  ;;  %v3298_v45 = vld [vmem:[%s4760_s11 + $0xc8] sm:$0xff] }
0x112b   : > { %v3290_v39 = vld [vmem:[%s4760_s11 + $0x88] sm:$0xff] }
0x112c   : > { %v2344_v54 = vmul.f32 1.442695, %v2343_v53  ;;  %v3289_v53 = vld [vmem:[%s4760_s11 + $0x80] sm:$0xff] }
0x112e   : > { %3797 = vpow2.f32 %v2344_v54  ;;  %v3287_v54 = vld [vmem:[%s4759_s10 + $0x1] ss:$0 sm:$0xff] }
0x1132   : > { %v3796_v55 = vpop.eup %3795 }
0x1133   : > { %v2517_v56 = vsel %vm831_vm4, %v3796_v55, 0.0 }
0x1134   : > { %2518 = vadd.xlane.f32.xlu0 %v2517_v56 }
0x113b   : > { %v3798_v57 = vpop.eup %3797 }
0x113c   : > { %v2346_v58 = vsel %vm831_vm4, %v3798_v57, 0.0 }
0x113d   : > { %2347 = vadd.xlane.f32.xlu0 %v2346_v58 }
0x1153   : > { %2522 = vrot.lane.b32.xlu0 %v4384_v61, %s4832_s26  ;;  %v3274_v61 = vld [vmem:[%s4818_s5 + $0x38] sm:$0xff]  ;;  %s3088_s5 = scalar_lea.sflag [#allocation6], %s4166_s22  ;;  %s3815_s26 = scalar_lea.vmem %s3814_s0, 256 }
0x1154   : > { %3612 = vmatpush3.msra.mxu1 %v3274_v61  ;;  %p3817_p1 = scmp.lt.s32.totalorder %s3815_s26, %s3809_s2 }
0x1155   : > { %3613 = vmatprep.subr.mxu1 %v3901_v8 }
0x1156   : > { %3614 = vmatpush3.msra.mxu1 %v3273_v3  ;;  %p3818_p2 = por %p3817_p1, %p3816_p0 }
0x1157   : > { %3615 = vmatprep.subr.mxu1 %v3901_v8 }
0x1158   : > { %3616 = vmatpush3.msra.mxu1 %v3272_v4  ;;  %v3306_v4 = vld [vmem:[%s4761_s12 + $0x1] ss:$0 sm:$0xff]  ;;  %p3819_p3 = pnand %p3818_p2, %p3812_p13 }
0x1159   : > { %3617 = vmatprep.subr.mxu1 %v3901_v8 }
0x115a   : > { %3618 = vmatpush3.msra.mxu1 %v3271_v5 }
0x115b   : > { %3633 = vmatprep.subr.mxu1 %v3901_v8 }
0x11bd   : > { %v2519_v0 = vpop.xlane.xlu0 %2518 }
0x11c6   : > { %v2348_v59 = vpop.xlane.xlu0 %2347 }
0x11c7   : > { %3799 = vrcp.f32 %v2348_v59 }
0x11c8   : > { %3801 = vrcp.f32 %v2519_v0 }
0x11ca   : > { %v2523_v1 = vpop.permute.xlu0 %2522 }
0x11d4   : > { %v3800_v60 = vpop.eup %3799 }
0x11d5   : > { %v2350_v62 = vmul.f32 %v3800_v60, %v3798_v57  ;;  %v3802_v63 = vpop.eup %3801 }
0x11d6   : > { %v2521_v2 = vmul.f32 %v3802_v63, %v3796_v55 }
0x11d7   : > { %3599 = vmatmul.mubr.msk.f32.vlgmr.msra.gmra.mxu0 %vm831_vm4, %v2350_v62 }
0x11d8   : > { %3607 = vmatpush3.msra.mxu0 %v2523_v1  ;;  %3608 = vmatprep.mubr.msk.f32.mxu0 %vm3902_vm1, %v3901_v8 }
0x11d9   : > { %3622 = vmatprep.subr.mxu0 %v3901_v8 }
0x11db   : > { %3609 = vmatmul.mubr.msk.f32.vlgmr.msra.gmra.mxu0 %vm831_vm4, %v2521_v2 }
0x11dc   : > { %3630 = vmatprep.mubr.msk.f32.mxu0 %vm3902_vm1, %v3901_v8  ;;  %3623 = vmatpush3.msra.mxu0 %v3285_v23  ;;  %v2949_v23 = vld [vmem:[%s4764_s15 + $0x28] sm:$0xff] }
0x11dd   : > { %3624 = vmatprep.subr.mxu0 %v3901_v8 }
0x1297   : > { %v2423_v6 = vpop.f32.mrf.mxu0 }
0x1298   : > { %2428 = vrot.lane.b32.xlu1 %v2423_v6, %s4833_s21  ;;  %s4793_s21 = sshll.u32 %s4040_s1, 7 }
0x1299   : > { %v3600_v7 = vpop.f32.mrf.mxu0  ;;  %s3112_s29 = scalar_lea.hbm %s4768_s19, %s4793_s21 }
0x129b   : > { %v2594_v9 = vpop.f32.mrf.mxu0 }
0x129c   : > { %2599 = vrot.lane.b32.xlu0 %v2594_v9, %s4834_s24 }
0x129d   : > { %v3610_v10 = vpop.f32.mrf.mxu0 }
0x129e   : > { %v2959_v10 = vld [vmem:[%s4764_s15 + $0x78] sm:$0xff] }
0x130a   : > { %v2429_v11 = vpop.permute.xlu1 %2428 }
0x130b   : > { %2431 = vst.msk [vmem:[#allocation2] sm:$0xff] %vm1337_vm7, %v2429_v11  ;;  %v2958_v11 = vld [vmem:[%s4764_s15 + $0x70] sm:$0xff] }
0x130e   : > { %v2600_v12 = vpop.permute.xlu0 %2599 }
0x130f   : > { %2602 = vst.msk [vmem:[#allocation2] sm:$0xff] %vm1509_vm8, %v2600_v12  ;;  %v2957_v12 = vld [vmem:[%s4764_s15 + $0x68] sm:$0xff] }
0x1316   : > { %v2603_v13 = vld [vmem:[#allocation2] sm:$0xff] }
0x1317   : > { %3620 = vmatmul.mubr.msk.f32.vlgmr.msra.gmra.mxu1 %vm713_vm0, %v2603_v13  ;;  %v2956_v13 = vld [vmem:[%s4764_s15 + $0x60] sm:$0xff] }
0x1318   : > { %3665 = vmatprep.mubr.msk.f32.mxu1 %vm3902_vm1, %v3901_v8  ;;  %3634 = vmatpush3.msra.mxu1 %v3304_v37 }
0x1319   : > { %3635 = vmatprep.subr.mxu1 %v3901_v8 }
0x131a   : > { %3636 = vmatpush3.msra.mxu1 %v3303_v38 }
0x131b   : > { %3637 = vmatprep.subr.mxu1 %v3901_v8 }
0x131c   : > { %3638 = vmatpush3.msra.mxu1 %v3302_v40 }
0x131d   : > { %3639 = vmatprep.subr.mxu1 %v3901_v8 }
0x131e   : > { %3640 = vmatpush3.msra.mxu1 %v3301_v41 }
0x131f   : > { %3641 = vmatprep.subr.mxu1 %v3901_v8 }
0x1320   : > { %3642 = vmatpush3.msra.mxu1 %v3300_v43 }
0x1321   : > { %3643 = vmatprep.subr.mxu1 %v3901_v8 }
0x1322   : > { %3644 = vmatpush3.msra.mxu1 %v3299_v44 }
0x1323   : > { %3645 = vmatprep.subr.mxu1 %v3901_v8 }
0x1324   : > { %3646 = vmatpush3.msra.mxu1 %v3298_v45 }
0x1325   : > { %3647 = vmatprep.subr.mxu1 %v3901_v8 }
0x1326   : > { %3648 = vmatpush3.msra.mxu1 %v3297_v46 }
0x1327   : > { %3649 = vmatprep.subr.mxu1 %v3901_v8 }
0x1328   : > { %3650 = vmatpush3.msra.mxu1 %v3296_v47 }
0x1329   : > { %3651 = vmatprep.subr.mxu1 %v3901_v8 }
0x132a   : > { %3652 = vmatpush3.msra.mxu1 %v3295_v48 }
0x132b   : > { %3653 = vmatprep.subr.mxu1 %v3901_v8 }
0x132c   : > { %3654 = vmatpush3.msra.mxu1 %v3294_v49 }
0x132d   : > { %3655 = vmatprep.subr.mxu1 %v3901_v8 }
0x132e   : > { %3656 = vmatpush3.msra.mxu1 %v3293_v50 }
0x132f   : > { %3657 = vmatprep.subr.mxu1 %v3901_v8 }
0x1330   : > { %3658 = vmatpush3.msra.mxu1 %v3292_v51 }
0x1331   : > { %3659 = vmatprep.subr.mxu1 %v3901_v8 }
0x1332   : > { %3660 = vmatpush3.msra.mxu1 %v3291_v52 }
0x1333   : > { %3661 = vmatprep.subr.mxu1 %v3901_v8 }
0x1334   : > { %3662 = vmatpush3.msra.mxu1 %v3290_v39 }
0x1335   : > { %3663 = vmatprep.subr.mxu1 %v3901_v8 }
0x1336   : > { %3664 = vmatpush3.msra.mxu1 %v3289_v53 }
0x13d7   : > { %v2678_v14 = vpop.f32.mrf.mxu1 }
0x13d8   : > { %v2682_v16 = vadd.f32 %v2678_v14, %v4353_v42  ;;  %v3284_v42 = vld [vmem:[%s4758_s9 + $0x30] sm:$0xff]  ;;  %v2955_v14 = vld [vmem:[%s4764_s15 + $0x58] sm:$0xff] }
0x13d9   : > { %v3621_v17 = vpop.f32.mrf.mxu1  ;;  %3625 = vmatpush3.msra.mxu0 %v3284_v42  ;;  %v2948_v42 = vld [vmem:[%s4764_s15 + $0x20] sm:$0xff] }
0x13da   : > { %v4491_v18 = vadd.f32 %v3277_v15, %v2682_v16  ;;  %3626 = vmatprep.subr.mxu0 %v3901_v8  ;;  %v2954_v15 = vld [vmem:[%s4764_s15 + $0x50] sm:$0xff]  ;;  %v2953_v16 = vld [vmem:[%s4764_s15 + $0x48] sm:$0xff]  ;;  %v2952_v17 = vld [vmem:[%s4764_s15 + $0x40] sm:$0xff] }
0x13db   : > { %3627 = vmatpush3.msra.mxu0 %v3283_v26  ;;  %v2947_v26 = vld [vmem:[%s4764_s15 + $0x18] sm:$0xff] }
0x13dc   : > { %v2696_v19 = vsel %vm713_vm0, %v4491_v18, 0.0  ;;  %3628 = vmatprep.subr.mxu0 %v3901_v8 }
0x13dd   : > { %2697 = vadd.xlane.f32.xlu1 %v2696_v19  ;;  %3629 = vmatpush3.msra.mxu0 %v3282_v27  ;;  %v2950_v19 = vld [vmem:[%s4764_s15 + $0x30] sm:$0xff] }
0x13de   : > { %3668 = vmatprep.subr.mxu0 %v3901_v8  ;;  %v2946_v27 = vld [vmem:[%s4764_s15 + $0x10] sm:$0xff] }
0x1466   : > { %v2698_v20 = vpop.xlane.xlu1 %2697 }
0x1467   : > { %v2699_v21 = vmul.f32 0.03125, %v2698_v20 }
0x1469   : > { %v2700_v22 = vsub.f32 %v4491_v18, %v2699_v21 }
0x146b   : > { %v2701_v24 = vmul.f32 %v2700_v22, %v2700_v22 }
0x146d   : > { %v2702_v25 = vsel %vm713_vm0, %v2701_v24, 0.0 }
0x146e   : > { %2703 = vadd.xlane.f32.xlu0 %v2702_v25 }
0x14f7   : > { %v2704_v28 = vpop.xlane.xlu0 %2703 }
0x14f8   : > { %v2705_v29 = vmul.f32 0.03125, %v2704_v28  ;;  %v2945_v28 = vld [vmem:[%s4764_s15 + $0x8] sm:$0xff] }
0x14fa   : > { %v2706_v30 = vadd.f32 1e-05, %v2705_v29  ;;  %v2944_v29 = vld [vmem:[%s4764_s15] sm:$0xff] }
0x14fc   : > { %3803 = vrsqrt.f32 %v2706_v30 }
0x1509   : > { %v3804_v31 = vpop.eup %3803 }
0x150a   : > { %v2708_v33 = vmul.f32 %v3804_v31, %v2700_v22 }
0x150c   : > { %v2715_v35 = vmul.f32 %v3280_v32, %v2708_v33 }
0x150e   : > { %v2722_v36 = vadd.f32 %v3281_v34, %v2715_v35  ;;  %v3307_v34 = vld [vmem:[%s4762_s13] ss:$0 sm:$0xff] }
0x1510   : > { %3631 = vmatmul.mubr.msk.f32.vlgmr.msra.gmra.mxu0 %vm713_vm0, %v2722_v36 }
0x1511   : > { %3700 = vmatprep.mubr.msk.f32.mxu0 %vm3902_vm1, %v3901_v8  ;;  %3669 = vmatpush3.xpose.msk.msra.mxu0 %vm713_vm0, %v2959_v10 }
0x1512   : > { %3670 = vmatprep.subr.mxu0 %v3901_v8 }
0x1515   : > { %3671 = vmatpush3.xpose.msk.msra.mxu0 %vm713_vm0, %v2958_v11 }
0x1516   : > { %3672 = vmatprep.subr.mxu0 %v3901_v8 }
0x1519   : > { %3673 = vmatpush3.xpose.msk.msra.mxu0 %vm713_vm0, %v2957_v12 }
0x151a   : > { %3674 = vmatprep.subr.mxu0 %v3901_v8 }
0x151d   : > { %3675 = vmatpush3.xpose.msk.msra.mxu0 %vm713_vm0, %v2956_v13 }
0x151e   : > { %3676 = vmatprep.subr.mxu0 %v3901_v8 }
0x1521   : > { %3677 = vmatpush3.xpose.msk.msra.mxu0 %vm713_vm0, %v2955_v14 }
0x1522   : > { %3678 = vmatprep.subr.mxu0 %v3901_v8 }
0x1525   : > { %3679 = vmatpush3.xpose.msk.msra.mxu0 %vm713_vm0, %v2954_v15 }
0x1526   : > { %3680 = vmatprep.subr.mxu0 %v3901_v8 }
0x1529   : > { %3681 = vmatpush3.xpose.msk.msra.mxu0 %vm713_vm0, %v2953_v16 }
0x152a   : > { %3682 = vmatprep.subr.mxu0 %v3901_v8 }
0x152d   : > { %3683 = vmatpush3.xpose.msk.msra.mxu0 %vm713_vm0, %v2952_v17 }
0x152e   : > { %3684 = vmatprep.subr.mxu0 %v3901_v8 }
0x15d0   : > { %v2805_v55 = vpop.f32.mrf.mxu0 }
0x15d1   : > { %v2806_v56 = vadd.f32 %v3287_v54, %v2805_v55 }
0x15d2   : > { %v3632_v57 = vpop.f32.mrf.mxu0 }
0x15d3   : > { %v2810_v58 = vmul.f32 0.044715, %v2806_v56  ;;  %v2809_v1 = vmul.f32 0.5, %v2806_v56 }
0x15d5   : > { %v2811_v0 = vmul.f32 %v2810_v58, %v2806_v56 }
0x15d7   : > { %v2812_v59 = vmul.f32 %v2811_v0, %v2806_v56 }
0x15d9   : > { %v2813_v60 = vadd.f32 %v2812_v59, %v2806_v56 }
0x15db   : > { %v2814_v62 = vmul.f32 0.7978846, %v2813_v60 }
0x15dd   : > { %3805 = vtanh.f32 %v2814_v62 }
0x15ea   : > { %v3806_v63 = vpop.eup %3805 }
0x15eb   : > { %v2816_v2 = vadd.f32 1.0, %v3806_v63 }
0x15ed   : > { %v2817_v61 = vmul.f32 %v2816_v2, %v2809_v1 }
0x15ef   : > { %3666 = vmatmul.mubr.f32.vlgmr.msra.gmra.mxu1 %v2817_v61 }
0x16af   : > { %v2901_v3 = vpop.f32.mrf.mxu1 }
0x16b0   : > { %v2905_v5 = vadd.f32 %v2901_v3, %v4491_v18  ;;  %v2951_v18 = vld [vmem:[%s4764_s15 + $0x38] sm:$0xff] }
0x16b1   : > { %v3667_v6 = vpop.f32.mrf.mxu1  ;;  %3685 = vmatpush3.xpose.msk.msra.mxu0 %vm713_vm0, %v2951_v18 }
0x16b2   : > { %v2914_v7 = vadd.f32 %v3306_v4, %v2905_v5  ;;  %3686 = vmatprep.subr.mxu0 %v3901_v8 }
0x16b4   : > { %v2917_v9 = vsel %vm713_vm0, %v2914_v7, 0.0 }
0x16b5   : > { %2918 = vadd.xlane.f32.xlu0 %v2917_v9  ;;  %3687 = vmatpush3.xpose.msk.msra.mxu0 %vm713_vm0, %v2950_v19 }
0x16b6   : > { %3688 = vmatprep.subr.mxu0 %v3901_v8 }
0x16b9   : > { %3689 = vmatpush3.xpose.msk.msra.mxu0 %vm713_vm0, %v2949_v23 }
0x16ba   : > { %3690 = vmatprep.subr.mxu0 %v3901_v8 }
0x16bd   : > { %3691 = vmatpush3.xpose.msk.msra.mxu0 %vm713_vm0, %v2948_v42 }
0x16be   : > { %3692 = vmatprep.subr.mxu0 %v3901_v8 }
0x16c1   : > { %3693 = vmatpush3.xpose.msk.msra.mxu0 %vm713_vm0, %v2947_v26 }
0x16c2   : > { %3694 = vmatprep.subr.mxu0 %v3901_v8 }
0x16c5   : > { %3695 = vmatpush3.xpose.msk.msra.mxu0 %vm713_vm0, %v2946_v27 }
0x16c6   : > { %3696 = vmatprep.subr.mxu0 %v3901_v8 }
0x16c9   : > { %3697 = vmatpush3.xpose.msk.msra.mxu0 %vm713_vm0, %v2945_v28 }
0x16ca   : > { %3698 = vmatprep.subr.mxu0 %v3901_v8  ;;  %v3308_v8 = vld [vmem:[%s4763_s14] ss:$0 sm:$0xff] }
0x16cd   : > { %3699 = vmatpush3.xpose.msk.msra.mxu0 %vm713_vm0, %v2944_v29 }
0x173e   : > { %v2919_v20 = vpop.xlane.xlu0 %2918 }
0x173f   : > { %v2920_v21 = vmul.f32 0.03125, %v2919_v20 }
0x1741   : > { %v2921_v22 = vsub.f32 %v2914_v7, %v2920_v21 }
0x1743   : > { %v2922_v24 = vmul.f32 %v2921_v22, %v2921_v22 }
0x1745   : > { %v2923_v25 = vsel %vm713_vm0, %v2922_v24, 0.0 }
0x1746   : > { %2924 = vadd.xlane.f32.xlu1 %v2923_v25 }
0x17cf   : > { %v2925_v30 = vpop.xlane.xlu1 %2924 }
0x17d0   : > { %v2926_v31 = vmul.f32 0.03125, %v2925_v30 }
0x17d2   : > { %v2927_v32 = vadd.f32 1e-05, %v2926_v31 }
0x17d4   : > { %3807 = vrsqrt.f32 %v2927_v32 }
0x17e1   : > { %v3808_v33 = vpop.eup %3807 }
0x17e2   : > { %v2929_v35 = vmul.f32 %v3808_v33, %v2921_v22 }
0x17e4   : > { %v2936_v36 = vmul.f32 %v3307_v34, %v2929_v35 }
0x17e6   : > { %v2943_v37 = vadd.f32 %v3308_v8, %v2936_v36 }
0x17e8   : > { %3701 = vmatmul.mubr.msk.f32.vlgmr.msra.gmra.mxu0 %vm713_vm0, %v2943_v37 }
0x17e9   : > { %3822 = shalt.err (!%p3819_p3)
}
0x17ea   : > { %s3823_s6 = scalar_lea.hbm %s3112_s29, 128  ;;  %s3827_s27 = scalar_lea.hbm %s4768_s19, 256 }
0x17eb   : > { %p3824_p4 = scmp.ne.s32.totalorder %s3112_s29, %s3823_s6  ;;  %p3828_p9 = scmp.lt.s32.totalorder %s3112_s29, %s4768_s19 }
0x17ec   : > { %p3829_p10 = scmp.lt.s32.totalorder %s3827_s27, %s3823_s6 }
0x17ed   : > { %p3825_p7 = pnand %p3824_p4, %p4057_p5 }
0x17ee   : > { %p3830_p11 = por %p3829_p10, %p3828_p9 }
0x17ef   : > { %p3826_p8 = pneg %p3825_p7 }
0x17f1   : > { %p3831_p12 = pnand %p3830_p11, %p3826_p8 }
0x17f3   : > { %3834 = shalt.err (!%p3831_p12)
}
0x17f4   : > { %3704 = dma.vmem_to_hbm [thread:$0]  (%p4057_p5), %s3115_s4, 128, %s3112_s29, %s3088_s5  }
0x17f5   : > { %s4835_s2 = sshll.u32 %s4166_s22, 3  ;;  %s4836_s26 = sshll.u32 %s4040_s1, 7 }
0x17f6   : > { %s610_s20 = scalar_lea.vmem [#allocation3], %s4835_s2  ;;  %s4709_s6 = scalar_lea.hbm %s4767_s18, %s4836_s26 }
0x17f7   : > { %s3101_s0 = sshll.u32 %s610_s20, 4  ;;  %s3083_s21 = scalar_lea.sflag [#allocation4], %s4166_s22  ;;  %s4702_s0 = int_to_ptr.vmem [resolvable:$true] %s3101_s0 }
0x17f8   : > { %s3835_s24 = scalar_lea.vmem %s4702_s0, 128  ;;  %s3918_s4 = smov [#allocation3]  }
0x17f9   : > { %p3836_p13 = scmp.ne.s32.totalorder %s4702_s0, %s3835_s24  ;;  %s3839_s5 = sshll.u32 %s3918_s4, 4  ;;  %s3840_s5 = int_to_ptr.vmem [resolvable:$false] %s3839_s5 }
0x17fa   : > { %s3841_s1 = scalar_lea.vmem %s3840_s5, 256  ;;  %p3842_p2 = scmp.lt.s32.totalorder %s4702_s0, %s3840_s5 }
0x17fb   : > { %p3837_p0 = pnand %p3836_p13, %p4057_p5  ;;  %p3843_p3 = scmp.lt.s32.totalorder %s3841_s1, %s3835_s24 }
0x17fd   : > { %p3838_p1 = pneg %p3837_p0  ;;  %p3844_p4 = por %p3843_p3, %p3842_p2 }
0x17ff   : > { %p3845_p7 = pnand %p3844_p4, %p3838_p1 }
0x18a8   : > { %v3077_v38 = vpop.f32.mrf.mxu0 }
0x18a9   : > { %3081 = vst [vmem:[%s610_s20] sm:$0xff] %v3077_v38 }
0x18aa   : > { %v3702_v40 = vpop.f32.mrf.mxu0 }
0x18ab   : > { %3848 = shalt.err (!%p3845_p7)
}
0x18ac   : > { %s3849_s29 = scalar_lea.hbm %s4709_s6, 128  ;;  %s3853_s2 = scalar_lea.hbm %s4767_s18, 256 }
0x18ad   : > { %p3850_p8 = scmp.ne.s32.totalorder %s4709_s6, %s3849_s29  ;;  %p3854_p11 = scmp.lt.s32.totalorder %s4709_s6, %s4767_s18 }
0x18ae   : > { %p3855_p12 = scmp.lt.s32.totalorder %s3853_s2, %s3849_s29 }
0x18af   : > { %p3851_p9 = pnand %p3850_p8, %p4057_p5 }
0x18b0   : > { %p3856_p13 = por %p3855_p12, %p3854_p11 }
0x18b1   : > { %p3852_p10 = pneg %p3851_p9 }
0x18b3   : > { %p3857_p0 = pnand %p3856_p13, %p3852_p10 }
0x18b5   : > { %3860 = shalt.err (!%p3857_p0)
}
0x18b6   : > { %3703 = dma.vmem_to_hbm [thread:$0]  (%p4057_p5), %s4702_s0, 128, %s4709_s6, %s3083_s21  }
0x18b7 PF: > { %s4837_s28 = sld [smem:[#allocation11_spill]] }
0x18b8   : > { %s4838_s7 = sld [smem:[#allocation9_spill]] }
0x18bd   : > { %p3714_p1 = scmp.ge.s32.totalorder %s4837_s28, 2 }
0x18be   : > { %s3126_s4 = sand.u32 1, %s4838_s7  }
0x18bf   : > { %p3708_p2 = pnand %p3714_p1, %p4061_p6  ;;  %s3127_s5 = scalar_lea.sflag [#allocation4], %s3126_s4 }
0x18c1   : > { %p3709_p3 = pneg %p3708_p2 }
0x18c3   : > { %3878 = dma.done.wait (%p3709_p3), %s3127_s5, 128  }
0x18c4   : > { %3880 = vsyncadd (%p3709_p3), %s3127_s5, 4294967168  ;;  %s3136_s1 = scalar_lea.sflag [#allocation6], %s3126_s4 }
0x18c5   : > { %3882 = dma.done.wait (%p3709_p3), %s3136_s1, 128  }
0x18c6   : > { %3884 = vsyncadd (%p3709_p3), %s3136_s1, 4294967168  ;;  %s4840_s21 = sld [smem:[#allocation12_spill]]  ;;  %s4843_s0 = smov %s3891_s30 }
0x18c7   : > { %s4841_s3 = sld [smem:[#allocation10_spill]] }
0x18c8   : > { %s4842_s20 = sld [smem:[#allocation13_spill]] }
0x18cc   : > { %p33_p5 = scmp.ge.s32.totalorder %s4840_s21, 4  }
0x18cd   : > { %s4844_s30 = smov %s4841_s3 }
0x18ce   :  { %35 = sbr.rel (!%p33_p5) target bundleno = 14 (0xe), region = 158 }
0x18d3   :  { %3141 = vsyncpa [#allocation4], 1 }
0x18d4   :  { %3143 = vsyncpa [#allocation4 + $0x1], 1 }
0x18d5   :  { %3144 = vsyncpa [#allocation6], 1 }
0x18d6   :  { %3146 = vsyncpa [#allocation6 + $0x1], 1 }

</bundles_post_ra>
